<compile_context>
chip_gen: v5e
topology: v5e:2x2
jax: 0.10.0
libtpu: 0.0.40
codegen_flags: <defaults>
</compile_context>

<pallas_src>
import functools

import jax
import jax.numpy as jnp
from jax.experimental import pallas as pl
from jax.experimental.pallas import tpu as pltpu


# --------------------------------------------------------------------------
# Helpers
# --------------------------------------------------------------------------
def _round_up(x, m):
    return ((x + m - 1) // m) * m


def _vmem_cap_bytes():
    """Physical VMEM per TensorCore (generation-aware); safe fallback."""
    try:
        info = pltpu.get_tpu_info()
        cap = int(getattr(info, "vmem_capacity_bytes", 0) or 0)
        if cap > 0:
            return cap
    except Exception:
        pass
    return 64 << 20  # conservative: correct for v7x, safe under-ask on v5e/v6e


# --------------------------------------------------------------------------
# Kernels
# --------------------------------------------------------------------------
def _mlp_resnet_resident_kernel(x_ref, fc_w_ref, fc_b_ref,
                                fc1_w_ref, fc1_b_ref,
                                fc2_w_ref, fc2_b_ref,
                                out_w_ref, out_b_ref,
                                o_ref, *, num_blocks):
    """All weights VMEM-resident; one grid step per batch tile."""
    wd = fc1_w_ref.dtype

    # Input projection (bf16 MXU inputs, f32 accumulation).
    h = jnp.dot(x_ref[...].astype(wd), fc_w_ref[...],
                preferred_element_type=jnp.float32) + fc_b_ref[...]

    # Straight-line unrolled residual blocks (identity skip).
    for i in range(num_blocks):
        t = jnp.dot(h.astype(wd), fc1_w_ref[i],
                    preferred_element_type=jnp.float32) + fc1_b_ref[i]
        t = jnp.maximum(t, 0.0)                               # relu
        t = jnp.dot(t.astype(wd), fc2_w_ref[i],
                    preferred_element_type=jnp.float32) + fc2_b_ref[i]
        h = h + t

    # Final relu + output projection (lane-dense padded columns).
    hf = jnp.maximum(h, 0.0)
    o_ref[...] = (jnp.dot(hf.astype(wd), out_w_ref[...],
                          preferred_element_type=jnp.float32)
                  + out_b_ref[...]).astype(o_ref.dtype)


def _mlp_resnet_streamed_kernel(x_ref, fc_w_ref, fc_b_ref,
                                fc1_w_ref, fc1_b_ref,
                                fc2_w_ref, fc2_b_ref,
                                out_w_ref, out_b_ref,
                                o_ref, h_ref):
    """One residual block per grid step; carried hidden state in VMEM scratch."""
    blk = pl.program_id(1)
    n_blk = pl.num_programs(1)
    wd = fc1_w_ref.dtype

    # ---- input projection: once per batch tile (block step 0) ------------
    @pl.when(blk == 0)
    def _():
        x = x_ref[...].astype(wd)
        h0 = jnp.dot(x, fc_w_ref[...], preferred_element_type=jnp.float32)
        h_ref[...] = h0 + fc_b_ref[...]

    # ---- one residual MLP block per grid step along axis 1 ---------------
    h = h_ref[...]                                            # f32 [TB, H]
    t = jnp.dot(h.astype(wd), fc1_w_ref[...],
                preferred_element_type=jnp.float32) + fc1_b_ref[...]
    t = jnp.maximum(t, 0.0)                                   # relu
    t = jnp.dot(t.astype(wd), fc2_w_ref[...],
                preferred_element_type=jnp.float32) + fc2_b_ref[...]
    h_new = h + t                                             # identity skip
    h_ref[...] = h_new

    # ---- final relu + output projection (last block step) ----------------
    # Reuse h_new from vregs; do not re-read h_ref.
    @pl.when(blk == n_blk - 1)
    def _():
        hf = jnp.maximum(h_new, 0.0)
        out = jnp.dot(hf.astype(wd), out_w_ref[...],
                      preferred_element_type=jnp.float32) + out_b_ref[...]
        o_ref[...] = out.astype(o_ref.dtype)


# --------------------------------------------------------------------------
# Wrapper
# --------------------------------------------------------------------------
def mlp_resnet_forward(x, params, num_blocks, *, batch_tile=None):
    (fc_w, fc_b, fc1_w, fc1_b, fc2_w, fc2_b, out_w, out_b) = params
    assert num_blocks >= 1
    batch, d_in = x.shape
    hidden = fc_w.shape[1]
    hidden4 = 4 * hidden
    out_dim = out_w.shape[1]
    wbytes = fc1_w.dtype.itemsize
    xbytes = x.dtype.itemsize

    # ---- lane/sublane friendly padding (zero weights -> exact results) ----
    d_pad = _round_up(d_in, 128)
    o_pad = _round_up(out_dim, 128)
    if d_pad != d_in:
        x = jnp.pad(x, ((0, 0), (0, d_pad - d_in)))
        fc_w = jnp.pad(fc_w, ((0, d_pad - d_in), (0, 0)))
    if o_pad != out_dim:
        out_w = jnp.pad(out_w, ((0, 0), (0, o_pad - out_dim)))
        out_b = jnp.pad(out_b, ((0, 0), (0, o_pad - out_dim)))

    # ---- generation-aware VMEM budget -------------------------------------
    usable = min(int(0.85 * _vmem_cap_bytes()), 100 << 20)

    block_w_bytes = (num_blocks * (hidden * hidden4 + hidden4 * hidden) * wbytes
                     + num_blocks * (hidden4 + hidden) * 4)
    static_w_bytes = ((d_pad * hidden + hidden * o_pad) * wbytes
                      + (hidden + o_pad) * 4)

    # Path selection: keep all block weights VMEM-resident when they fit with
    # comfortable headroom (also covers a double-buffered fallback).
    resident = (block_w_bytes + static_w_bytes) <= int(0.45 * usable)

    if resident:
        per_row = 2 * d_pad * xbytes + 2 * o_pad * 4 \
            + 4 * (2 * hidden + 2 * hidden4)
        fixed = block_w_bytes + static_w_bytes
    else:
        # streamed path: one block's fc1/fc2 double-buffered + h scratch
        per_row = 2 * d_pad * xbytes + 2 * o_pad * 4 \
            + 4 * (3 * hidden + 2 * hidden4)
        fixed = (2 * ((hidden * hidden4 + hidden4 * hidden) * wbytes
                      + (hidden4 + hidden) * 4)
                 + static_w_bytes)
        # TODO(synk): a 4H-chunking path for hidden >~ 1k (per review) is not
        #             implemented; the streamed path handles the common sizes.

    budget = int(0.7 * usable) - fixed
    tb_max = max(8, (budget // max(per_row, 1)) // 8 * 8) if budget > 0 else 8

    b8 = _round_up(batch, 8)
    if batch_tile is None:
        # resident: modest tiles amortize overhead; streamed: fewest tiles
        # possible so block weights are re-streamed as little as possible.
        batch_tile = 256 if resident else b8
    tb = max(8, min(_round_up(batch_tile, 8), b8, tb_max))
    if resident and (b8 // tb) < 2 and b8 >= 16:
        # v7x megacore: give both TensorCores a batch tile when possible.
        tb = max(8, min(tb, _round_up(pl.cdiv(b8, 2), 8)))
    b_pad = pl.cdiv(batch, tb) * tb
    n_tiles = b_pad // tb

    x_p = x if b_pad == batch else jnp.pad(x, ((0, b_pad - batch), (0, 0)))

    vmem_limit = int(1.25 * (fixed + tb * per_row)) + (2 << 20)
    vmem_limit = min(max(vmem_limit, 32 << 20), usable)

    flops = int(2 * b_pad * d_pad * hidden
                + num_blocks * (2 * b_pad * hidden * hidden4
                                + 2 * b_pad * hidden4 * hidden)
                + 2 * b_pad * hidden * o_pad)
    weight_passes = 1 if resident else n_tiles
    bytes_accessed = int(b_pad * d_pad * xbytes
                         + static_w_bytes + block_w_bytes * weight_passes
                         + b_pad * o_pad * 4)

    def _build(single_buffer):
        # Single-buffer grid-invariant operands (constant index_map) to save
        # VMEM; fall back to default double-buffering if unsupported.
        inv = {"pipeline_mode": pl.Buffered(1)} if single_buffer else {}
        if resident:
            kernel = functools.partial(_mlp_resnet_resident_kernel,
                                       num_blocks=num_blocks)
            grid = (n_tiles,)
            in_specs = [
                pl.BlockSpec((tb, d_pad), lambda bt: (bt, 0)),             # x
                pl.BlockSpec((d_pad, hidden), lambda bt: (0, 0), **inv),   # fc_w
                pl.BlockSpec((1, hidden), lambda bt: (0, 0), **inv),       # fc_b
                pl.BlockSpec((num_blocks, hidden, hidden4),
                             lambda bt: (0, 0, 0), **inv),                 # fc1_w
                pl.BlockSpec((num_blocks, 1, hidden4),
                             lambda bt: (0, 0, 0), **inv),                 # fc1_b
                pl.BlockSpec((num_blocks, hidden4, hidden),
                             lambda bt: (0, 0, 0), **inv),                 # fc2_w
                pl.BlockSpec((num_blocks, 1, hidden),
                             lambda bt: (0, 0, 0), **inv),                 # fc2_b
                pl.BlockSpec((hidden, o_pad), lambda bt: (0, 0), **inv),   # out_w
                pl.BlockSpec((1, o_pad), lambda bt: (0, 0), **inv),        # out_b
            ]
            out_specs = pl.BlockSpec((tb, o_pad), lambda bt: (bt, 0))
            scratch = []
            sem = ("parallel",)
        else:
            kernel = _mlp_resnet_streamed_kernel
            grid = (n_tiles, num_blocks)
            in_specs = [
                pl.BlockSpec((tb, d_pad), lambda bt, b: (bt, 0)),              # x
                pl.BlockSpec((d_pad, hidden), lambda bt, b: (0, 0), **inv),    # fc_w
                pl.BlockSpec((1, hidden), lambda bt, b: (0, 0), **inv),        # fc_b
                pl.BlockSpec((pl.Squeezed(), hidden, hidden4),
                             lambda bt, b: (b, 0, 0)),                         # fc1_w[b]
                pl.BlockSpec((pl.Squeezed(), 1, hidden4),
                             lambda bt, b: (b, 0, 0)),                         # fc1_b[b]
                pl.BlockSpec((pl.Squeezed(), hidden4, hidden),
                             lambda bt, b: (b, 0, 0)),                         # fc2_w[b]
                pl.BlockSpec((pl.Squeezed(), 1, hidden),
                             lambda bt, b: (b, 0, 0)),                         # fc2_b[b]
                pl.BlockSpec((hidden, o_pad), lambda bt, b: (0, 0), **inv),    # out_w
                pl.BlockSpec((1, o_pad), lambda bt, b: (0, 0), **inv),         # out_b
            ]
            out_specs = pl.BlockSpec((tb, o_pad), lambda bt, b: (bt, 0))
            scratch = [pltpu.VMEM((tb, hidden), jnp.float32)]
            # block axis must stay "arbitrary" (scratch accumulator carry).
            sem = ("parallel", "arbitrary")
        return kernel, grid, in_specs, out_specs, scratch, sem

    def _call(single_buffer):
        kernel, grid, in_specs, out_specs, scratch, sem = _build(single_buffer)
        return pl.pallas_call(
            kernel,
            out_shape=jax.ShapeDtypeStruct((b_pad, o_pad), jnp.float32),
            grid_spec=pltpu.PrefetchScalarGridSpec(
                num_scalar_prefetch=0,
                grid=grid,
                in_specs=in_specs,
                out_specs=out_specs,
                scratch_shapes=scratch),
            compiler_params=pltpu.CompilerParams(
                dimension_semantics=sem,
                vmem_limit_bytes=vmem_limit),
            cost_estimate=pl.CostEstimate(
                flops=flops, transcendentals=0,
                bytes_accessed=bytes_accessed),
        )(x_p, fc_w, fc_b, fc1_w, fc1_b, fc2_w, fc2_b, out_w, out_b)

    try:
        out = _call(True)
    except Exception:
        # If this JAX build rejects pipeline_mode=pl.Buffered(1), retry with
        # default double-buffering of the grid-invariant weights.
        out = _call(False)

    return out[:batch, :out_dim]


# --------------------------------------------------------------------------
# Parameter construction (PyTorch nn.Linear default init, weight as [in, out])
# --------------------------------------------------------------------------
def _init_linear(key, fan_in, fan_out, w_dtype):
    kw, kb = jax.random.split(key)
    bound = 1.0 / float(fan_in) ** 0.5
    w = jax.random.uniform(kw, (fan_in, fan_out), jnp.float32, -bound, bound)
    b = jax.random.uniform(kb, (fan_out,), jnp.float32, -bound, bound)
    return w.astype(w_dtype), b


def make_params(key, num_blocks, input_dim, out_dim, hidden_dim,
                w_dtype=jnp.bfloat16):
    keys = jax.random.split(key, 2 + num_blocks)
    fc_w, fc_b = _init_linear(keys[0], input_dim + 128, hidden_dim, w_dtype)
    out_w, out_b = _init_linear(keys[1], hidden_dim, out_dim, w_dtype)

    fc1_ws, fc1_bs, fc2_ws, fc2_bs = [], [], [], []
    for i in range(num_blocks):
        k1, k2 = jax.random.split(keys[2 + i])
        w1, b1 = _init_linear(k1, hidden_dim, hidden_dim * 4, w_dtype)
        w2, b2 = _init_linear(k2, hidden_dim * 4, hidden_dim, w_dtype)
        fc1_ws.append(w1); fc1_bs.append(b1)
        fc2_ws.append(w2); fc2_bs.append(b2)

    return (
        fc_w, fc_b.reshape(1, -1),                   # [Din+128, H], [1, H]
        jnp.stack(fc1_ws),                           # [nb, H, 4H]  bf16
        jnp.stack(fc1_bs)[:, None, :],               # [nb, 1, 4H]  f32
        jnp.stack(fc2_ws),                           # [nb, 4H, H]  bf16
        jnp.stack(fc2_bs)[:, None, :],               # [nb, 1, H]   f32
        out_w, out_b.reshape(1, -1),                 # [H, out], [1, out]
    )


# --------------------------------------------------------------------------
# Pure-JAX reference (same bf16-weight / f32-accumulate precision)
# --------------------------------------------------------------------------
def mlp_resnet_reference(x, params, num_blocks):
    (fc_w, fc_b, fc1_w, fc1_b, fc2_w, fc2_b, out_w, out_b) = params
    wd = fc_w.dtype
    h = jnp.dot(x.astype(wd), fc_w, preferred_element_type=jnp.float32) + fc_b
    for b in range(num_blocks):
        t = jnp.dot(h.astype(wd), fc1_w[b],
                    preferred_element_type=jnp.float32) + fc1_b[b]
        t = jnp.maximum(t, 0.0)
        t = jnp.dot(t.astype(wd), fc2_w[b],
                    preferred_element_type=jnp.float32) + fc2_b[b]
        h = h + t
    h = jnp.maximum(h, 0.0)
    return jnp.dot(h.astype(wd), out_w, preferred_element_type=jnp.float32) + out_b


# --------------------------------------------------------------------------
if __name__ == "__main__":
    # Small config consistent with the module (fc expects input_dim + 128).
    num_blocks = 2
    input_dim = 8
    out_dim = 4
    hidden_dim = 128     # lane-aligned hidden width
    batch = 16

    key = jax.random.PRNGKey(0)
    kx, kp = jax.random.split(key)
    x = jax.random.normal(kx, (batch, input_dim + 128), jnp.float32)
    params = make_params(kp, num_blocks, input_dim, out_dim, hidden_dim)

    out = mlp_resnet_forward(x, params, num_blocks)
    out = jax.block_until_ready(out)

    ref = mlp_resnet_reference(x, params, num_blocks)
    assert out.shape == (batch, out_dim)
    assert jnp.allclose(out, ref, atol=2e-3, rtol=2e-3), "mismatch vs reference"

    print("KERNEL_OK")
</pallas_src>

<mosaic_0001>
module attributes {stable_mosaic.version = 11 : i64} {
  func.func @_mlp_resnet_resident_kernel(%arg0: i32, %arg1: memref<8x256xf32, #tpu.memory_space<vmem>>, %arg2: memref<256x128xbf16, #tpu.memory_space<vmem>>, %arg3: memref<1x128xf32, #tpu.memory_space<vmem>>, %arg4: memref<2x128x512xbf16, #tpu.memory_space<vmem>>, %arg5: memref<2x1x512xf32, #tpu.memory_space<vmem>>, %arg6: memref<2x512x128xbf16, #tpu.memory_space<vmem>>, %arg7: memref<2x1x128xf32, #tpu.memory_space<vmem>>, %arg8: memref<128x128xbf16, #tpu.memory_space<vmem>>, %arg9: memref<1x128xf32, #tpu.memory_space<vmem>>, %arg10: memref<8x128xf32, #tpu.memory_space<vmem>>) attributes {dimension_semantics = [#tpu.dimension_semantics<parallel>], iteration_bounds = array<i64: 2>, scalar_prefetch = 0 : i64, scratch_operands = 0 : i64, tpu.core_type = #tpu.core_type<tc>, window_params = [{transform_indices = @transform_0, window_bounds = array<i64: 8, 256>}, {pipeline_mode = #tpu.pipeline_mode<synchronous>, transform_indices = @transform_1, window_bounds = array<i64: 256, 128>}, {pipeline_mode = #tpu.pipeline_mode<synchronous>, transform_indices = @transform_2, window_bounds = array<i64: 1, 128>}, {pipeline_mode = #tpu.pipeline_mode<synchronous>, transform_indices = @transform_3, window_bounds = array<i64: 2, 128, 512>}, {pipeline_mode = #tpu.pipeline_mode<synchronous>, transform_indices = @transform_4, window_bounds = array<i64: 2, 1, 512>}, {pipeline_mode = #tpu.pipeline_mode<synchronous>, transform_indices = @transform_5, window_bounds = array<i64: 2, 512, 128>}, {pipeline_mode = #tpu.pipeline_mode<synchronous>, transform_indices = @transform_6, window_bounds = array<i64: 2, 1, 128>}, {pipeline_mode = #tpu.pipeline_mode<synchronous>, transform_indices = @transform_7, window_bounds = array<i64: 128, 128>}, {pipeline_mode = #tpu.pipeline_mode<synchronous>, transform_indices = @transform_8, window_bounds = array<i64: 1, 128>}, {transform_indices = @transform_9, window_bounds = array<i64: 8, 128>}]} {
    %c0 = arith.constant 0 : index
    %c0_0 = arith.constant 0 : index
    %0 = vector.load %arg1[%c0, %c0_0] : memref<8x256xf32, #tpu.memory_space<vmem>>, vector<8x256xf32>
    %1 = arith.truncf %0 : vector<8x256xf32> to vector<8x256xbf16>
    %c0_1 = arith.constant 0 : index
    %c0_2 = arith.constant 0 : index
    %2 = vector.load %arg2[%c0_1, %c0_2] : memref<256x128xbf16, #tpu.memory_space<vmem>>, vector<256x128xbf16>
    %cst = arith.constant dense<0.000000e+00> : vector<8x128xf32>
    %3 = tpu.matmul %1, %2, %cst {dimension_numbers = #tpu.dot_dimension_numbers<[1], [0], [0], [1], [0, 0, 1, 1], [], []>} : vector<8x256xbf16>, vector<256x128xbf16>, vector<8x128xf32> -> vector<8x128xf32>
    %c0_3 = arith.constant 0 : index
    %c0_4 = arith.constant 0 : index
    %4 = vector.load %arg3[%c0_3, %c0_4] : memref<1x128xf32, #tpu.memory_space<vmem>>, vector<1x128xf32>
    %5 = vector.broadcast %4 : vector<1x128xf32> to vector<8x128xf32>
    %6 = arith.addf %3, %5 : vector<8x128xf32>
    %7 = arith.truncf %6 : vector<8x128xf32> to vector<8x128xbf16>
    %c0_5 = arith.constant 0 : index
    %c0_6 = arith.constant 0 : index
    %c0_7 = arith.constant 0 : index
    %8 = vector.load %arg4[%c0_5, %c0_6, %c0_7] : memref<2x128x512xbf16, #tpu.memory_space<vmem>>, vector<1x128x512xbf16>
    %9 = vector.shape_cast %8 : vector<1x128x512xbf16> to vector<128x512xbf16>
    %cst_8 = arith.constant dense<0.000000e+00> : vector<8x512xf32>
    %10 = tpu.matmul %7, %9, %cst_8 {dimension_numbers = #tpu.dot_dimension_numbers<[1], [0], [0], [1], [0, 0, 1, 1], [], []>} : vector<8x128xbf16>, vector<128x512xbf16>, vector<8x512xf32> -> vector<8x512xf32>
    %c0_9 = arith.constant 0 : index
    %c0_10 = arith.constant 0 : index
    %c0_11 = arith.constant 0 : index
    %11 = vector.load %arg5[%c0_9, %c0_10, %c0_11] : memref<2x1x512xf32, #tpu.memory_space<vmem>>, vector<1x1x512xf32>
    %12 = vector.shape_cast %11 : vector<1x1x512xf32> to vector<1x512xf32>
    %13 = vector.broadcast %12 : vector<1x512xf32> to vector<8x512xf32>
    %14 = arith.addf %10, %13 : vector<8x512xf32>
    %cst_12 = arith.constant 0.000000e+00 : f32
    %15 = vector.broadcast %cst_12 : f32 to vector<8x512xf32>
    %16 = arith.maximumf %14, %15 : vector<8x512xf32>
    %17 = arith.truncf %16 : vector<8x512xf32> to vector<8x512xbf16>
    %c0_13 = arith.constant 0 : index
    %c0_14 = arith.constant 0 : index
    %c0_15 = arith.constant 0 : index
    %18 = vector.load %arg6[%c0_13, %c0_14, %c0_15] : memref<2x512x128xbf16, #tpu.memory_space<vmem>>, vector<1x512x128xbf16>
    %19 = vector.shape_cast %18 : vector<1x512x128xbf16> to vector<512x128xbf16>
    %cst_16 = arith.constant dense<0.000000e+00> : vector<8x128xf32>
    %20 = tpu.matmul %17, %19, %cst_16 {dimension_numbers = #tpu.dot_dimension_numbers<[1], [0], [0], [1], [0, 0, 1, 1], [], []>} : vector<8x512xbf16>, vector<512x128xbf16>, vector<8x128xf32> -> vector<8x128xf32>
    %c0_17 = arith.constant 0 : index
    %c0_18 = arith.constant 0 : index
    %c0_19 = arith.constant 0 : index
    %21 = vector.load %arg7[%c0_17, %c0_18, %c0_19] : memref<2x1x128xf32, #tpu.memory_space<vmem>>, vector<1x1x128xf32>
    %22 = vector.shape_cast %21 : vector<1x1x128xf32> to vector<1x128xf32>
    %23 = vector.broadcast %22 : vector<1x128xf32> to vector<8x128xf32>
    %24 = arith.addf %20, %23 : vector<8x128xf32>
    %25 = arith.addf %6, %24 : vector<8x128xf32>
    %26 = arith.truncf %25 : vector<8x128xf32> to vector<8x128xbf16>
    %c1 = arith.constant 1 : index
    %c0_20 = arith.constant 0 : index
    %c0_21 = arith.constant 0 : index
    %27 = vector.load %arg4[%c1, %c0_20, %c0_21] : memref<2x128x512xbf16, #tpu.memory_space<vmem>>, vector<1x128x512xbf16>
    %28 = vector.shape_cast %27 : vector<1x128x512xbf16> to vector<128x512xbf16>
    %cst_22 = arith.constant dense<0.000000e+00> : vector<8x512xf32>
    %29 = tpu.matmul %26, %28, %cst_22 {dimension_numbers = #tpu.dot_dimension_numbers<[1], [0], [0], [1], [0, 0, 1, 1], [], []>} : vector<8x128xbf16>, vector<128x512xbf16>, vector<8x512xf32> -> vector<8x512xf32>
    %c1_23 = arith.constant 1 : index
    %c0_24 = arith.constant 0 : index
    %c0_25 = arith.constant 0 : index
    %30 = vector.load %arg5[%c1_23, %c0_24, %c0_25] : memref<2x1x512xf32, #tpu.memory_space<vmem>>, vector<1x1x512xf32>
    %31 = vector.shape_cast %30 : vector<1x1x512xf32> to vector<1x512xf32>
    %32 = vector.broadcast %31 : vector<1x512xf32> to vector<8x512xf32>
    %33 = arith.addf %29, %32 : vector<8x512xf32>
    %cst_26 = arith.constant 0.000000e+00 : f32
    %34 = vector.broadcast %cst_26 : f32 to vector<8x512xf32>
    %35 = arith.maximumf %33, %34 : vector<8x512xf32>
    %36 = arith.truncf %35 : vector<8x512xf32> to vector<8x512xbf16>
    %c1_27 = arith.constant 1 : index
    %c0_28 = arith.constant 0 : index
    %c0_29 = arith.constant 0 : index
    %37 = vector.load %arg6[%c1_27, %c0_28, %c0_29] : memref<2x512x128xbf16, #tpu.memory_space<vmem>>, vector<1x512x128xbf16>
    %38 = vector.shape_cast %37 : vector<1x512x128xbf16> to vector<512x128xbf16>
    %cst_30 = arith.constant dense<0.000000e+00> : vector<8x128xf32>
    %39 = tpu.matmul %36, %38, %cst_30 {dimension_numbers = #tpu.dot_dimension_numbers<[1], [0], [0], [1], [0, 0, 1, 1], [], []>} : vector<8x512xbf16>, vector<512x128xbf16>, vector<8x128xf32> -> vector<8x128xf32>
    %c1_31 = arith.constant 1 : index
    %c0_32 = arith.constant 0 : index
    %c0_33 = arith.constant 0 : index
    %40 = vector.load %arg7[%c1_31, %c0_32, %c0_33] : memref<2x1x128xf32, #tpu.memory_space<vmem>>, vector<1x1x128xf32>
    %41 = vector.shape_cast %40 : vector<1x1x128xf32> to vector<1x128xf32>
    %42 = vector.broadcast %41 : vector<1x128xf32> to vector<8x128xf32>
    %43 = arith.addf %39, %42 : vector<8x128xf32>
    %44 = arith.addf %25, %43 : vector<8x128xf32>
    %cst_34 = arith.constant 0.000000e+00 : f32
    %45 = vector.broadcast %cst_34 : f32 to vector<8x128xf32>
    %46 = arith.maximumf %44, %45 : vector<8x128xf32>
    %47 = arith.truncf %46 : vector<8x128xf32> to vector<8x128xbf16>
    %c0_35 = arith.constant 0 : index
    %c0_36 = arith.constant 0 : index
    %48 = vector.load %arg8[%c0_35, %c0_36] : memref<128x128xbf16, #tpu.memory_space<vmem>>, vector<128x128xbf16>
    %cst_37 = arith.constant dense<0.000000e+00> : vector<8x128xf32>
    %49 = tpu.matmul %47, %48, %cst_37 {dimension_numbers = #tpu.dot_dimension_numbers<[1], [0], [0], [1], [0, 0, 1, 1], [], []>} : vector<8x128xbf16>, vector<128x128xbf16>, vector<8x128xf32> -> vector<8x128xf32>
    %c0_38 = arith.constant 0 : index
    %c0_39 = arith.constant 0 : index
    %50 = vector.load %arg9[%c0_38, %c0_39] : memref<1x128xf32, #tpu.memory_space<vmem>>, vector<1x128xf32>
    %51 = vector.broadcast %50 : vector<1x128xf32> to vector<8x128xf32>
    %52 = arith.addf %49, %51 : vector<8x128xf32>
    %c0_40 = arith.constant 0 : index
    %c0_41 = arith.constant 0 : index
    %53 = vector.load %arg10[%c0_40, %c0_41] : memref<8x128xf32, #tpu.memory_space<vmem>>, vector<8x128xf32>
    tpu.vector_store %arg10[%c0_40, %c0_41], %52 {strides = array<i32>} : memref<8x128xf32, #tpu.memory_space<vmem>>, vector<8x128xf32>,
    return
  }
  func.func @transform_0(%arg0: i32) -> (i32, i32) {
    %c0_i32 = arith.constant 0 : i32
    %c0_i32_0 = arith.constant 0 : i32
    return %arg0, %c0_i32 : i32, i32
  }
  func.func @transform_1(%arg0: i32) -> (i32, i32) {
    %c0_i32 = arith.constant 0 : i32
    %c0_i32_0 = arith.constant 0 : i32
    %c0_i32_1 = arith.constant 0 : i32
    return %c0_i32, %c0_i32_0 : i32, i32
  }
  func.func @transform_2(%arg0: i32) -> (i32, i32) {
    %c0_i32 = arith.constant 0 : i32
    %c0_i32_0 = arith.constant 0 : i32
    %c0_i32_1 = arith.constant 0 : i32
    return %c0_i32, %c0_i32_0 : i32, i32
  }
  func.func @transform_3(%arg0: i32) -> (i32, i32, i32) {
    %c0_i32 = arith.constant 0 : i32
    %c0_i32_0 = arith.constant 0 : i32
    %c0_i32_1 = arith.constant 0 : i32
    %c0_i32_2 = arith.constant 0 : i32
    return %c0_i32, %c0_i32_0, %c0_i32_1 : i32, i32, i32
  }
  func.func @transform_4(%arg0: i32) -> (i32, i32, i32) {
    %c0_i32 = arith.constant 0 : i32
    %c0_i32_0 = arith.constant 0 : i32
    %c0_i32_1 = arith.constant 0 : i32
    %c0_i32_2 = arith.constant 0 : i32
    return %c0_i32, %c0_i32_0, %c0_i32_1 : i32, i32, i32
  }
  func.func @transform_5(%arg0: i32) -> (i32, i32, i32) {
    %c0_i32 = arith.constant 0 : i32
    %c0_i32_0 = arith.constant 0 : i32
    %c0_i32_1 = arith.constant 0 : i32
    %c0_i32_2 = arith.constant 0 : i32
    return %c0_i32, %c0_i32_0, %c0_i32_1 : i32, i32, i32
  }
  func.func @transform_6(%arg0: i32) -> (i32, i32, i32) {
    %c0_i32 = arith.constant 0 : i32
    %c0_i32_0 = arith.constant 0 : i32
    %c0_i32_1 = arith.constant 0 : i32
    %c0_i32_2 = arith.constant 0 : i32
    return %c0_i32, %c0_i32_0, %c0_i32_1 : i32, i32, i32
  }
  func.func @transform_7(%arg0: i32) -> (i32, i32) {
    %c0_i32 = arith.constant 0 : i32
    %c0_i32_0 = arith.constant 0 : i32
    %c0_i32_1 = arith.constant 0 : i32
    return %c0_i32, %c0_i32_0 : i32, i32
  }
  func.func @transform_8(%arg0: i32) -> (i32, i32) {
    %c0_i32 = arith.constant 0 : i32
    %c0_i32_0 = arith.constant 0 : i32
    %c0_i32_1 = arith.constant 0 : i32
    return %c0_i32, %c0_i32_0 : i32, i32
  }
  func.func @transform_9(%arg0: i32) -> (i32, i32) {
    %c0_i32 = arith.constant 0 : i32
    %c0_i32_0 = arith.constant 0 : i32
    return %arg0, %c0_i32 : i32, i32
  }
}

module attributes {stable_mosaic.version = 11 : i64} {
  func.func @_mlp_resnet_resident_kernel(%arg0: i32, %arg1: memref<8x256xf32, #tpu.memory_space<vmem>>, %arg2: memref<256x128xbf16, #tpu.memory_space<vmem>>, %arg3: memref<1x128xf32, #tpu.memory_space<vmem>>, %arg4: memref<2x128x512xbf16, #tpu.memory_space<vmem>>, %arg5: memref<2x1x512xf32, #tpu.memory_space<vmem>>, %arg6: memref<2x512x128xbf16, #tpu.memory_space<vmem>>, %arg7: memref<2x1x128xf32, #tpu.memory_space<vmem>>, %arg8: memref<128x128xbf16, #tpu.memory_space<vmem>>, %arg9: memref<1x128xf32, #tpu.memory_space<vmem>>, %arg10: memref<8x128xf32, #tpu.memory_space<vmem>>) attributes {dimension_semantics = [#tpu.dimension_semantics<parallel>], iteration_bounds = array<i64: 2>, scalar_prefetch = 0 : i64, scratch_operands = 0 : i64, tpu.core_type = #tpu.core_type<tc>, window_params = [{transform_indices = @transform_0, window_bounds = array<i64: 8, 256>}, {pipeline_mode = #tpu.pipeline_mode<synchronous>, transform_indices = @transform_1, window_bounds = array<i64: 256, 128>}, {pipeline_mode = #tpu.pipeline_mode<synchronous>, transform_indices = @transform_2, window_bounds = array<i64: 1, 128>}, {pipeline_mode = #tpu.pipeline_mode<synchronous>, transform_indices = @transform_3, window_bounds = array<i64: 2, 128, 512>}, {pipeline_mode = #tpu.pipeline_mode<synchronous>, transform_indices = @transform_4, window_bounds = array<i64: 2, 1, 512>}, {pipeline_mode = #tpu.pipeline_mode<synchronous>, transform_indices = @transform_5, window_bounds = array<i64: 2, 512, 128>}, {pipeline_mode = #tpu.pipeline_mode<synchronous>, transform_indices = @transform_6, window_bounds = array<i64: 2, 1, 128>}, {pipeline_mode = #tpu.pipeline_mode<synchronous>, transform_indices = @transform_7, window_bounds = array<i64: 128, 128>}, {pipeline_mode = #tpu.pipeline_mode<synchronous>, transform_indices = @transform_8, window_bounds = array<i64: 1, 128>}, {transform_indices = @transform_9, window_bounds = array<i64: 8, 128>}]} {
    %c0 = arith.constant 0 : index
    %c0_0 = arith.constant 0 : index
    %0 = vector.load %arg1[%c0, %c0_0] : memref<8x256xf32, #tpu.memory_space<vmem>>, vector<8x256xf32>
    %1 = arith.truncf %0 : vector<8x256xf32> to vector<8x256xbf16>
    %c0_1 = arith.constant 0 : index
    %c0_2 = arith.constant 0 : index
    %2 = vector.load %arg2[%c0_1, %c0_2] : memref<256x128xbf16, #tpu.memory_space<vmem>>, vector<256x128xbf16>
    %cst = arith.constant dense<0.000000e+00> : vector<8x128xf32>
    %3 = tpu.matmul %1, %2, %cst {dimension_numbers = #tpu.dot_dimension_numbers<[1], [0], [0], [1], [0, 0, 1, 1], [], []>} : vector<8x256xbf16>, vector<256x128xbf16>, vector<8x128xf32> -> vector<8x128xf32>
    %c0_3 = arith.constant 0 : index
    %c0_4 = arith.constant 0 : index
    %4 = vector.load %arg3[%c0_3, %c0_4] : memref<1x128xf32, #tpu.memory_space<vmem>>, vector<1x128xf32>
    %5 = vector.broadcast %4 : vector<1x128xf32> to vector<8x128xf32>
    %6 = arith.addf %3, %5 : vector<8x128xf32>
    %7 = arith.truncf %6 : vector<8x128xf32> to vector<8x128xbf16>
    %c0_5 = arith.constant 0 : index
    %c0_6 = arith.constant 0 : index
    %c0_7 = arith.constant 0 : index
    %8 = vector.load %arg4[%c0_5, %c0_6, %c0_7] : memref<2x128x512xbf16, #tpu.memory_space<vmem>>, vector<1x128x512xbf16>
    %9 = vector.shape_cast %8 : vector<1x128x512xbf16> to vector<128x512xbf16>
    %cst_8 = arith.constant dense<0.000000e+00> : vector<8x512xf32>
    %10 = tpu.matmul %7, %9, %cst_8 {dimension_numbers = #tpu.dot_dimension_numbers<[1], [0], [0], [1], [0, 0, 1, 1], [], []>} : vector<8x128xbf16>, vector<128x512xbf16>, vector<8x512xf32> -> vector<8x512xf32>
    %c0_9 = arith.constant 0 : index
    %c0_10 = arith.constant 0 : index
    %c0_11 = arith.constant 0 : index
    %11 = vector.load %arg5[%c0_9, %c0_10, %c0_11] : memref<2x1x512xf32, #tpu.memory_space<vmem>>, vector<1x1x512xf32>
    %12 = vector.shape_cast %11 : vector<1x1x512xf32> to vector<1x512xf32>
    %13 = vector.broadcast %12 : vector<1x512xf32> to vector<8x512xf32>
    %14 = arith.addf %10, %13 : vector<8x512xf32>
    %cst_12 = arith.constant 0.000000e+00 : f32
    %15 = vector.broadcast %cst_12 : f32 to vector<8x512xf32>
    %16 = arith.maximumf %14, %15 : vector<8x512xf32>
    %17 = arith.truncf %16 : vector<8x512xf32> to vector<8x512xbf16>
    %c0_13 = arith.constant 0 : index
    %c0_14 = arith.constant 0 : index
    %c0_15 = arith.constant 0 : index
    %18 = vector.load %arg6[%c0_13, %c0_14, %c0_15] : memref<2x512x128xbf16, #tpu.memory_space<vmem>>, vector<1x512x128xbf16>
    %19 = vector.shape_cast %18 : vector<1x512x128xbf16> to vector<512x128xbf16>
    %cst_16 = arith.constant dense<0.000000e+00> : vector<8x128xf32>
    %20 = tpu.matmul %17, %19, %cst_16 {dimension_numbers = #tpu.dot_dimension_numbers<[1], [0], [0], [1], [0, 0, 1, 1], [], []>} : vector<8x512xbf16>, vector<512x128xbf16>, vector<8x128xf32> -> vector<8x128xf32>
    %c0_17 = arith.constant 0 : index
    %c0_18 = arith.constant 0 : index
    %c0_19 = arith.constant 0 : index
    %21 = vector.load %arg7[%c0_17, %c0_18, %c0_19] : memref<2x1x128xf32, #tpu.memory_space<vmem>>, vector<1x1x128xf32>
    %22 = vector.shape_cast %21 : vector<1x1x128xf32> to vector<1x128xf32>
    %23 = vector.broadcast %22 : vector<1x128xf32> to vector<8x128xf32>
    %24 = arith.addf %20, %23 : vector<8x128xf32>
    %25 = arith.addf %6, %24 : vector<8x128xf32>
    %26 = arith.truncf %25 : vector<8x128xf32> to vector<8x128xbf16>
    %c1 = arith.constant 1 : index
    %c0_20 = arith.constant 0 : index
    %c0_21 = arith.constant 0 : index
    %27 = vector.load %arg4[%c1, %c0_20, %c0_21] : memref<2x128x512xbf16, #tpu.memory_space<vmem>>, vector<1x128x512xbf16>
    %28 = vector.shape_cast %27 : vector<1x128x512xbf16> to vector<128x512xbf16>
    %cst_22 = arith.constant dense<0.000000e+00> : vector<8x512xf32>
    %29 = tpu.matmul %26, %28, %cst_22 {dimension_numbers = #tpu.dot_dimension_numbers<[1], [0], [0], [1], [0, 0, 1, 1], [], []>} : vector<8x128xbf16>, vector<128x512xbf16>, vector<8x512xf32> -> vector<8x512xf32>
    %c1_23 = arith.constant 1 : index
    %c0_24 = arith.constant 0 : index
    %c0_25 = arith.constant 0 : index
    %30 = vector.load %arg5[%c1_23, %c0_24, %c0_25] : memref<2x1x512xf32, #tpu.memory_space<vmem>>, vector<1x1x512xf32>
    %31 = vector.shape_cast %30 : vector<1x1x512xf32> to vector<1x512xf32>
    %32 = vector.broadcast %31 : vector<1x512xf32> to vector<8x512xf32>
    %33 = arith.addf %29, %32 : vector<8x512xf32>
    %cst_26 = arith.constant 0.000000e+00 : f32
    %34 = vector.broadcast %cst_26 : f32 to vector<8x512xf32>
    %35 = arith.maximumf %33, %34 : vector<8x512xf32>
    %36 = arith.truncf %35 : vector<8x512xf32> to vector<8x512xbf16>
    %c1_27 = arith.constant 1 : index
    %c0_28 = arith.constant 0 : index
    %c0_29 = arith.constant 0 : index
    %37 = vector.load %arg6[%c1_27, %c0_28, %c0_29] : memref<2x512x128xbf16, #tpu.memory_space<vmem>>, vector<1x512x128xbf16>
    %38 = vector.shape_cast %37 : vector<1x512x128xbf16> to vector<512x128xbf16>
    %cst_30 = arith.constant dense<0.000000e+00> : vector<8x128xf32>
    %39 = tpu.matmul %36, %38, %cst_30 {dimension_numbers = #tpu.dot_dimension_numbers<[1], [0], [0], [1], [0, 0, 1, 1], [], []>} : vector<8x512xbf16>, vector<512x128xbf16>, vector<8x128xf32> -> vector<8x128xf32>
    %c1_31 = arith.constant 1 : index
    %c0_32 = arith.constant 0 : index
    %c0_33 = arith.constant 0 : index
    %40 = vector.load %arg7[%c1_31, %c0_32, %c0_33] : memref<2x1x128xf32, #tpu.memory_space<vmem>>, vector<1x1x128xf32>
    %41 = vector.shape_cast %40 : vector<1x1x128xf32> to vector<1x128xf32>
    %42 = vector.broadcast %41 : vector<1x128xf32> to vector<8x128xf32>
    %43 = arith.addf %39, %42 : vector<8x128xf32>
    %44 = arith.addf %25, %43 : vector<8x128xf32>
    %cst_34 = arith.constant 0.000000e+00 : f32
    %45 = vector.broadcast %cst_34 : f32 to vector<8x128xf32>
    %46 = arith.maximumf %44, %45 : vector<8x128xf32>
    %47 = arith.truncf %46 : vector<8x128xf32> to vector<8x128xbf16>
    %c0_35 = arith.constant 0 : index
    %c0_36 = arith.constant 0 : index
    %48 = vector.load %arg8[%c0_35, %c0_36] : memref<128x128xbf16, #tpu.memory_space<vmem>>, vector<128x128xbf16>
    %cst_37 = arith.constant dense<0.000000e+00> : vector<8x128xf32>
    %49 = tpu.matmul %47, %48, %cst_37 {dimension_numbers = #tpu.dot_dimension_numbers<[1], [0], [0], [1], [0, 0, 1, 1], [], []>} : vector<8x128xbf16>, vector<128x128xbf16>, vector<8x128xf32> -> vector<8x128xf32>
    %c0_38 = arith.constant 0 : index
    %c0_39 = arith.constant 0 : index
    %50 = vector.load %arg9[%c0_38, %c0_39] : memref<1x128xf32, #tpu.memory_space<vmem>>, vector<1x128xf32>
    %51 = vector.broadcast %50 : vector<1x128xf32> to vector<8x128xf32>
    %52 = arith.addf %49, %51 : vector<8x128xf32>
    %c0_40 = arith.constant 0 : index
    %c0_41 = arith.constant 0 : index
    %53 = vector.load %arg10[%c0_40, %c0_41] : memref<8x128xf32, #tpu.memory_space<vmem>>, vector<8x128xf32>
    tpu.vector_store %arg10[%c0_40, %c0_41], %52 {strides = array<i32>} : memref<8x128xf32, #tpu.memory_space<vmem>>, vector<8x128xf32>,
    return
  }
  func.func @transform_0(%arg0: i32) -> (i32, i32) {
    %c0_i32 = arith.constant 0 : i32
    %c0_i32_0 = arith.constant 0 : i32
    return %arg0, %c0_i32 : i32, i32
  }
  func.func @transform_1(%arg0: i32) -> (i32, i32) {
    %c0_i32 = arith.constant 0 : i32
    %c0_i32_0 = arith.constant 0 : i32
    %c0_i32_1 = arith.constant 0 : i32
    return %c0_i32, %c0_i32_0 : i32, i32
  }
  func.func @transform_2(%arg0: i32) -> (i32, i32) {
    %c0_i32 = arith.constant 0 : i32
    %c0_i32_0 = arith.constant 0 : i32
    %c0_i32_1 = arith.constant 0 : i32
    return %c0_i32, %c0_i32_0 : i32, i32
  }
  func.func @transform_3(%arg0: i32) -> (i32, i32, i32) {
    %c0_i32 = arith.constant 0 : i32
    %c0_i32_0 = arith.constant 0 : i32
    %c0_i32_1 = arith.constant 0 : i32
    %c0_i32_2 = arith.constant 0 : i32
    return %c0_i32, %c0_i32_0, %c0_i32_1 : i32, i32, i32
  }
  func.func @transform_4(%arg0: i32) -> (i32, i32, i32) {
    %c0_i32 = arith.constant 0 : i32
    %c0_i32_0 = arith.constant 0 : i32
    %c0_i32_1 = arith.constant 0 : i32
    %c0_i32_2 = arith.constant 0 : i32
    return %c0_i32, %c0_i32_0, %c0_i32_1 : i32, i32, i32
  }
  func.func @transform_5(%arg0: i32) -> (i32, i32, i32) {
    %c0_i32 = arith.constant 0 : i32
    %c0_i32_0 = arith.constant 0 : i32
    %c0_i32_1 = arith.constant 0 : i32
    %c0_i32_2 = arith.constant 0 : i32
    return %c0_i32, %c0_i32_0, %c0_i32_1 : i32, i32, i32
  }
  func.func @transform_6(%arg0: i32) -> (i32, i32, i32) {
    %c0_i32 = arith.constant 0 : i32
    %c0_i32_0 = arith.constant 0 : i32
    %c0_i32_1 = arith.constant 0 : i32
    %c0_i32_2 = arith.constant 0 : i32
    return %c0_i32, %c0_i32_0, %c0_i32_1 : i32, i32, i32
  }
  func.func @transform_7(%arg0: i32) -> (i32, i32) {
    %c0_i32 = arith.constant 0 : i32
    %c0_i32_0 = arith.constant 0 : i32
    %c0_i32_1 = arith.constant 0 : i32
    return %c0_i32, %c0_i32_0 : i32, i32
  }
  func.func @transform_8(%arg0: i32) -> (i32, i32) {
    %c0_i32 = arith.constant 0 : i32
    %c0_i32_0 = arith.constant 0 : i32
    %c0_i32_1 = arith.constant 0 : i32
    return %c0_i32, %c0_i32_0 : i32, i32
  }
  func.func @transform_9(%arg0: i32) -> (i32, i32) {
    %c0_i32 = arith.constant 0 : i32
    %c0_i32_0 = arith.constant 0 : i32
    return %arg0, %c0_i32 : i32, i32
  }
}

</mosaic_0001>

<bundles_post_ra>
// kernel: tpu_custom_call.1
= control target key start
LH: loop header
LB: loop body
LE: loop exit
PB: predicated region body
PF: predicated region fallthrough
CT: control target
= control target key end

     0   :  { %s3376_s0 = inlined_call_operand.hbm [shape: f32[16,256], index: 0, kind: input, shape index: {}]   ;;  %s3377_s1 = inlined_call_operand.hbm [shape: bf16[256,128], index: 1, kind: input, shape index: {}]   ;;  %s3378_s2 = inlined_call_operand.vmem [shape: f32[1,128], index: 2, kind: input, shape index: {}]   ;;  %s3379_s3 = inlined_call_operand.hbm [shape: bf16[2,128,512], index: 3, kind: input, shape index: {}]   ;;  %s3380_s4 = inlined_call_operand.hbm [shape: f32[2,1,512], index: 4, kind: input, shape index: {}]   ;;  %s3381_s5 = inlined_call_operand.hbm [shape: bf16[2,512,128], index: 5, kind: input, shape index: {}]   ;;  %s3382_s6 = inlined_call_operand.vmem [shape: f32[2,1,128], index: 6, kind: input, shape index: {}]   ;;  %s3383_s7 = inlined_call_operand.hbm [shape: bf16[128,128], index: 7, kind: input, shape index: {}]   ;;  %s3384_s8 = inlined_call_operand.vmem [shape: f32[1,128], index: 8, kind: input, shape index: {}]   ;;  %s3385_s9 = inlined_call_operand.hbm [shape: f32[16,128], index: 9, kind: output, shape index: {}]  }
   0x1   :  { %3386 = sst [smem:[#allocation19_spill]] %s3377_s1 }
   0x2   :  { %3387 = sst [smem:[#allocation20_spill]] %s3379_s3 }
   0x3   :  { %3388 = sst [smem:[#allocation21_spill]] %s3380_s4 }
   0x4   :  { %14 = vsyncpa [#allocation3], 0 }
   0x5   :  { %16 = vsyncpa [#allocation3 + $0x1], 0 }
   0x6   :  { %17 = vsyncpa [#allocation6], 0 }
   0x7   :  { %18 = vsyncpa [#allocation9], 0 }
   0x8   :  { %19 = vsyncpa [#allocation12], 0 }
   0x9   :  { %20 = vsyncpa [#allocation4], 0 }
   0xa   :  { %22 = vsyncpa [#allocation4 + $0x1], 0  ;;  %s3179_s30 = smov 0   ;;  %s3181_s10 = smov 0  }
   0xb   :  { %s3183_s11 = smov 0   ;;  %s3185_s12 = smov 0  }
   0xc LB: > { %s3389_s1 = sld [smem:[#allocation19_spill]]  ;;  %s3203_s16 = sadd.s32 4294967295, %s3118_s12   ;;  %s3118_s12 = sphi %s3185_s12, %s3402_s12   ;;  %s3114_s11 = sphi %s3183_s11, %s3401_s11   ;;  %s3110_s10 = sphi %s3181_s10, %s3400_s10   ;;  %s3106_s30 = sphi %s3179_s30, %s3399_s30  }
   0xd   : > { %p1971_p0 = scmp.ge.s32.totalorder %s3118_s12, 1  ;;  %p49_p1 = scmp.eq.s32.totalorder %s3203_s16, 0 }
   0xe   : > { %p253_p2 = scmp.lt.s32.totalorder %s3118_s12, 3  ;;  %s3120_s18 = smov [#allocation5]  }
   0xf   : > { %s266_s19 = sshll.u32 %s3120_s18, 4  ;;  %s3391_s4 = sld [smem:[#allocation21_spill]]  ;;  %s267_s19 = int_to_ptr.vmem [resolvable:$true] %s266_s19 }
  0x10   : > { %p3208_p3 = pnand %p1971_p0, %p253_p2  ;;  %s3393_s3 = sld [smem:[#allocation20_spill]] }
  0x11   : > { %s3121_s27 = smov [#allocation8]   ;;  %s3122_s29 = smov 64  }
  0x12   : > { %s264_s15 = sshll.u32 %s3389_s1, 4  ;;  %p2779_p4 = pneg %p3208_p3  ;;  %s265_s15 = int_to_ptr.hbm [resolvable:$true] %s264_s15 }
  0x13   : > { %s297_s28 = sshll.u32 %s3121_s27, 4  ;;  %s3123_s13 = smov 4   ;;  %s298_s28 = int_to_ptr.vmem [resolvable:$true] %s297_s28 }
  0x14   : > { %p3220_p6 = pnand %p2779_p4, %p49_p1  ;;  %s3124_s14 = smov [#allocation7]  }
  0x15   : > { %s295_s22 = sshll.u32 %s3391_s4, 4  ;;  %s283_s18 = sshll.u32 %s3124_s14, 4  ;;  %s296_s22 = int_to_ptr.hbm [resolvable:$true] %s295_s22  ;;  %s284_s18 = int_to_ptr.vmem [resolvable:$true] %s283_s18 }
  0x16   : > { %s281_s26 = sshll.u32 %s3393_s3, 4  ;;  %s309_s24 = sshll.u32 %s3381_s5, 4  ;;  %s282_s26 = int_to_ptr.hbm [resolvable:$true] %s281_s26  ;;  %s310_s24 = int_to_ptr.hbm [resolvable:$true] %s309_s24 }
  0x17   : > { %2782 = dma.hbm_to_vmem [thread:$0]  (!%p3220_p6), %s265_s15, 2048, %s267_s19, [#allocation6], %s3122_s29, %s3122_s29, %s3123_s13  }
  0x18   : > { %2788 = dma.hbm_to_vmem [thread:$0]  (!%p3220_p6), %s296_s22, 128, %s298_s28, [#allocation9], %s3122_s29, %s3122_s29, %s3123_s13  }
  0x19   : > { %s3125_s25 = smov 256   ;;  %s3126_s27 = smov 16  }
  0x1a   : > { %2785 = dma.hbm_to_vmem [thread:$0]  (!%p3220_p6), %s282_s26, 8192, %s284_s18, [#allocation6], %s3125_s25, %s3125_s25, %s3126_s27  }
  0x1b   : > { %s3127_s15 = smov [#allocation10]   ;;  %s326_s14 = sshll.u32 %s3383_s7, 4  ;;  %s327_s14 = int_to_ptr.hbm [resolvable:$true] %s326_s14 }
  0x1c   : > { %s311_s19 = sshll.u32 %s3127_s15, 4  ;;  %s3128_s26 = smov [#allocation11]   ;;  %s312_s19 = int_to_ptr.vmem [resolvable:$true] %s311_s19 }
  0x1d   : > { %2791 = dma.hbm_to_vmem [thread:$0]  (!%p3220_p6), %s310_s24, 8192, %s312_s19, [#allocation9], %s3122_s29, %s3122_s29, %s3123_s13  }
  0x1e   : > { %s328_s18 = sshll.u32 %s3128_s26, 4  ;;  %s1970_s20 = sadd.s32 4294967294, %s3118_s12   ;;  %s329_s18 = int_to_ptr.vmem [resolvable:$true] %s328_s18 }
  0x1f   : > { %2794 = dma.hbm_to_vmem [thread:$0]  (!%p3220_p6), %s327_s14, 1024, %s329_s18, [#allocation12], %s3122_s29, %s3122_s29, %s3123_s13  }
  0x20   : > { %s3245_s21 = sadd.s32 1, %s3118_s12   ;;  %s35_s25 = sadd.s32 1, %s3114_s11 }
  0x21   : > { %s32_s27 = ssub.s32 %s3118_s12, %s3245_s21  ;;  %p42_p7 = scmp.ne.s32.totalorder %s3114_s11, %s3110_s10 }
  0x22   : > { %p33_p8 = scmp.eq.s32.totalorder %s32_s27, 0  ;;  %p43_p9 = scmp.eq.s32.totalorder %s3118_s12, 0 }
  0x23   : > { %p48_p10 = scmp.ne.s32.totalorder %s3110_s10, %s3106_s30  ;;  %p240_p11 = scmp.eq.s32.totalorder %s3203_s16, 1 }
  0x24   : > { %s3257_s24 = scalar_select %p33_p8, %s3114_s11, %s35_s25  }
  0x25   : > { %p3261_p12 = por %p49_p1, %p48_p10  ;;  %p3265_p13 = por %p240_p11, %p42_p7 }
  0x26   : > { %p246_p0 = scmp.eq.s32.totalorder %s1970_s20, 1  ;;  %p44_p2 = por %p43_p9, %p42_p7 }
  0x27   : > { %s345_s13 = sand.u32 1, %s3114_s11   ;;  %p2808_p6 = scmp.lt.s32.totalorder %s3118_s12, 2 }
  0x28   : > { %p3270_p4 = por %p246_p0, %p48_p10  ;;  %s1978_s19 = sshll.u32 %s345_s13, 4 }
  0x29   : > { %s2602_s22 = sshll.u32 %s3118_s12, 4  ;;  %s349_s25 = scalar_lea.vmem [#allocation2], %s1978_s19 }
  0x2a   : > { %s354_s26 = scalar_lea.hbm %s3376_s0, %s2602_s22  ;;  %s358_s27 = sshll.u32 %s349_s25, 4  ;;  %s359_s27 = int_to_ptr.vmem [resolvable:$true] %s358_s27 }
  0x2b   : > { %s356_s18 = sshll.u32 %s354_s26, 4  ;;  %p3279_p8 = pnand %p2808_p6, %p44_p2  ;;  %s357_s18 = int_to_ptr.hbm [resolvable:$true] %s356_s18 }
  0x2c   : > { %s346_s1 = scalar_lea.sflag [#allocation3], %s345_s13  ;;  %s3010_s3 = sshra.s32 %s357_s18, 4  ;;  %s3011_s3 = int_to_ptr.hbm [resolvable:$true] %s3010_s3 }
  0x2d   : > { %s3012_s4 = scalar_lea.hbm %s3011_s3, 16  ;;  %p3014_p9 = pneg %p3279_p8 }
  0x2e   : > { %p3013_p7 = scmp.ne.s32.totalorder %s3011_s3, %s3012_s4  ;;  %s3017_s19 = scalar_lea.hbm %s3376_s0, 32 }
  0x2f   : > { %p3018_p0 = scmp.lt.s32.totalorder %s3011_s3, %s3376_s0  ;;  %p3019_p2 = scmp.lt.s32.totalorder %s3017_s19, %s3012_s4 }
  0x30   : > { %p3015_p10 = pnand %p3014_p9, %p3013_p7 }
  0x31   : > { %p3020_p6 = por %p3019_p2, %p3018_p0 }
  0x32   : > { %p3016_p11 = pneg %p3015_p10 }
  0x34   : > { %p3021_p5 = pnand %p3020_p6, %p3016_p11 }
  0x36   : > { %3024 = shalt.err (!%p3021_p5)
}
  0x37   : > { %2798 = dma.hbm_to_vmem [thread:$0]  (!%p3279_p8), %s357_s18, 256, %s359_s27, %s346_s1  }
  0x38   : > { %367 = sbr.rel (%p3208_p3) target bundleno = 938 (0x3aa), region = 56  ;;  %s3296_s13 = sand.u32 (!%p3208_p3), 1, %s3110_s10  }
  0x39   : > { %s1982_s25 = sshll.u32 (!%p3208_p3), %s3296_s13, 4  ;;  %s370_s22 = scalar_lea.sflag (!%p3208_p3), [#allocation3], %s3296_s13 }
  0x3a   : > { %s3300_s28 = scalar_lea.vmem (!%p3208_p3), [#allocation2], %s1982_s25 }
  0x3d   : > { %3085 = dma.done.wait (%p3261_p12), %s370_s22, 256  }
  0x3e   : > { %3087 = vsyncadd (%p3261_p12), %s370_s22, 4294967040 }
  0x3f   : > { %3089 = dma.done.wait (%p49_p1), [#allocation6], 10240  }
  0x40   : > { %3091 = vsyncadd (%p49_p1), [#allocation6], 4294957056 }
  0x41   : > { %3093 = dma.done.wait (%p49_p1), [#allocation9], 8320  }
  0x42   : > { %3095 = vsyncadd (%p49_p1), [#allocation9], 4294958976 }
  0x43   : > { %3097 = dma.done.wait (%p49_p1), [#allocation12], 1024  }
  0x44   : > { %3099 = vsyncadd (%p49_p1), [#allocation12], 4294966272  ;;  %v2610_v0 = vld [vmem:[#allocation5 + $0x38] sm:$0xff]  ;;  %v2609_v2 = vld [vmem:[#allocation5 + $0x30] sm:$0xff]  ;;  %s2599_s27 = sshll.u32 %s3203_s16, 3  ;;  %s1988_s20 = sshll.u32 %s3296_s13, 3 }
  0x45   : > { %v2618_v1 = vld [vmem:[#allocation5 + $0x78] sm:$0xff]  ;;  %570 = vmatpush.bf16.msra.mxu0 %v2610_v0  ;;  %v2617_v3 = vld [vmem:[#allocation5 + $0x70] sm:$0xff]  ;;  %v2608_v4 = vld [vmem:[#allocation5 + $0x28] sm:$0xff]  ;;  %s1847_s26 = scalar_lea.hbm %s3385_s9, %s2599_s27  ;;  %s1837_s4 = scalar_lea.sflag [#allocation4], %s3296_s13 }
  0x46   : > { %583 = vmatpush.bf16.msra.mxu1 %v2618_v1  ;;  %v2616_v5 = vld [vmem:[#allocation5 + $0x68] sm:$0xff]  ;;  %v2167_v6 = vld [vmem:[#allocation7 + $0xe0] sm:$0xf]  ;;  %v2649_v7 = vld [vmem:[#allocation7 + $0xec] sm:$0xf0]  ;;  %s1851_s3 = sshll.u32 %s1847_s26, 4  ;;  %s1852_s3 = int_to_ptr.hbm [resolvable:$true] %s1851_s3 }
  0x47   : > { %v2647_v8 = vld [vmem:[#allocation7 + $0xe4] sm:$0xf]  ;;  %v2168_v9 = vor.u32 %v2649_v7, %v2167_v6  ;;  %v2169_v10 = vld [vmem:[#allocation7 + $0xf0] sm:$0xf0]  ;;  %v2151_v12 = vld [vmem:[#allocation7 + $0xc0] sm:$0xf] }
  0x48   : > { %v2172_v11 = vor.u32 %v2647_v8, %v2169_v10  ;;  %v2645_v13 = vld [vmem:[#allocation7 + $0xcc] sm:$0xf0]  ;;  %v2643_v14 = vld [vmem:[#allocation7 + $0xc4] sm:$0xf]  ;;  %v2153_v15 = vld [vmem:[#allocation7 + $0xd0] sm:$0xf0] }
  0x49   : > { %571 = vmatpush.bf16.msra.mxu0 %v2609_v2  ;;  %799 = vmatpush.bf16.msra.mxu2 %v2168_v9  ;;  %v2607_v16 = vld [vmem:[#allocation5 + $0x20] sm:$0xff]  ;;  %v2152_v18 = vor.u32 %v2645_v13, %v2151_v12  ;;  %v2156_v19 = vor.u32 %v2643_v14, %v2153_v15  ;;  %v2641_v21 = vld [vmem:[#allocation7 + $0xac] sm:$0xf0]  ;;  %v2137_v23 = vld [vmem:[#allocation7 + $0xb0] sm:$0xf0]  ;;  %s3054_s16 = sshra.s32 %s1852_s3, 4  ;;  %s3055_s16 = int_to_ptr.hbm [resolvable:$true] %s3054_s16 }
  0x4a   : > { %584 = vmatpush.bf16.msra.mxu1 %v2617_v3  ;;  %v2615_v17 = vld [vmem:[#allocation5 + $0x60] sm:$0xff]  ;;  %812 = vmatpush.bf16.msra.mxu3 %v2172_v11  ;;  %v2606_v24 = vld [vmem:[#allocation5 + $0x18] sm:$0xff]  ;;  %v2637_v28 = vld [vmem:[#allocation7 + $0x8c] sm:$0xf0]  ;;  %s3056_s17 = scalar_lea.hbm %s3055_s16, 8  ;;  %s3060_s27 = scalar_lea.hbm %s3385_s9, 16 }
  0x4b   : > { %v2135_v20 = vld [vmem:[#allocation7 + $0xa0] sm:$0xf]  ;;  %v2639_v22 = vld [vmem:[#allocation7 + $0xa4] sm:$0xf]  ;;  %v2614_v26 = vld [vmem:[#allocation5 + $0x58] sm:$0xff]  ;;  %p3057_p1 = scmp.ne.s32.totalorder %s3055_s16, %s3056_s17  ;;  %p3061_p12 = scmp.lt.s32.totalorder %s3055_s16, %s3385_s9 }
  0x4c   : > { %v2136_v25 = vor.u32 %v2641_v21, %v2135_v20  ;;  %v2119_v27 = vld [vmem:[#allocation7 + $0x80] sm:$0xf]  ;;  %v2140_v29 = vor.u32 %v2639_v22, %v2137_v23  ;;  %v2635_v30 = vld [vmem:[#allocation7 + $0x84] sm:$0xf]  ;;  %v2121_v31 = vld [vmem:[#allocation7 + $0x90] sm:$0xf0]  ;;  %p3062_p8 = scmp.lt.s32.totalorder %s3060_s27, %s3056_s17 }
  0x4d   : > { %572 = vmatpush.bf16.msra.mxu0 %v2608_v4  ;;  %800 = vmatpush.bf16.msra.mxu2 %v2152_v18  ;;  %v2605_v32 = vld [vmem:[#allocation5 + $0x10] sm:$0xff]  ;;  %v2120_v33 = vor.u32 %v2637_v28, %v2119_v27  ;;  %v2103_v35 = vld [vmem:[#allocation7 + $0x60] sm:$0xf]  ;;  %v2124_v37 = vor.u32 %v2635_v30, %v2121_v31  ;;  %v2631_v38 = vld [vmem:[#allocation7 + $0x64] sm:$0xf]  ;;  %p3058_p3 = pnand %p3057_p1, %p3265_p13 }
  0x4e   : > { %585 = vmatpush.bf16.msra.mxu1 %v2616_v5  ;;  %813 = vmatpush.bf16.msra.mxu3 %v2156_v19  ;;  %v2613_v34 = vld [vmem:[#allocation5 + $0x50] sm:$0xff]  ;;  %v2604_v40 = vld [vmem:[#allocation5 + $0x8] sm:$0xff]  ;;  %v2087_v43 = vld [vmem:[#allocation7 + $0x40] sm:$0xf]  ;;  %p3063_p7 = por %p3062_p8, %p3061_p12 }
  0x4f   : > { %v2633_v36 = vld [vmem:[#allocation7 + $0x6c] sm:$0xf0]  ;;  %v2105_v39 = vld [vmem:[#allocation7 + $0x70] sm:$0xf0]  ;;  %v2612_v41 = vld [vmem:[#allocation5 + $0x48] sm:$0xff]  ;;  %p3059_p5 = pneg %p3058_p3 }
  0x50   : > { %v2104_v42 = vor.u32 %v2633_v36, %v2103_v35  ;;  %v2629_v44 = vld [vmem:[#allocation7 + $0x4c] sm:$0xf0]  ;;  %v2175_v45 = vld [vmem:[#allocation7 + $0xe8] sm:$0xf]  ;;  %v2108_v46 = vor.u32 %v2631_v38, %v2105_v39  ;;  %v2650_v47 = vld [vmem:[#allocation7 + $0xf4] sm:$0xf0] }
  0x51   : > { %573 = vmatpush.bf16.msra.mxu0 %v2607_v16  ;;  %801 = vmatpush.bf16.msra.mxu2 %v2136_v25  ;;  %v2648_v48 = vld [vmem:[#allocation7 + $0xec] sm:$0xf]  ;;  %v2177_v49 = vld [vmem:[#allocation7 + $0xf8] sm:$0xf0]  ;;  %v2603_v50 = vld [vmem:[#allocation5] sm:$0xff]  ;;  %v2088_v51 = vor.u32 %v2629_v44, %v2087_v43  ;;  %v2176_v57 = vor.u32 %v2650_v47, %v2175_v45  ;;  %p3064_p9 = pnand %p3063_p7, %p3059_p5 }
  0x52   : > { %586 = vmatpush.bf16.msra.mxu1 %v2615_v17  ;;  %814 = vmatpush.bf16.msra.mxu3 %v2140_v29  ;;  %v2627_v52 = vld [vmem:[#allocation7 + $0x44] sm:$0xf]  ;;  %v2089_v53 = vld [vmem:[#allocation7 + $0x50] sm:$0xf0]  ;;  %v435_v56 = vld [vmem:[%s3300_s28 + $0x8] sm:$0xff]  ;;  %v2180_v58 = vor.u32 %v2648_v48, %v2177_v49 }
  0x53   : > { %v2611_v54 = vld [vmem:[#allocation5 + $0x40] sm:$0xff]  ;;  %v2159_v59 = vld [vmem:[#allocation7 + $0xc8] sm:$0xf]  ;;  %v2646_v60 = vld [vmem:[#allocation7 + $0xd4] sm:$0xf0]  ;;  %v2092_v63 = vor.u32 %v2627_v52, %v2089_v53  ;;  %v437_v1 = vpack.c.bf16 %v435_v56, %v435_v56 }
  0x54   : > { %v434_v55 = vld [vmem:[%s3300_s28] sm:$0xff]  ;;  %v2644_v61 = vld [vmem:[#allocation7 + $0xcc] sm:$0xf]  ;;  %v2161_v62 = vld [vmem:[#allocation7 + $0xd8] sm:$0xf0]  ;;  %v2160_v2 = vor.u32 %v2646_v60, %v2159_v59  ;;  %s433_s28 = scalar_lea.vmem [#allocation13], %s1988_s20 }
  0x55   : > { %574 = vmatpush.bf16.msra.mxu0 %v2606_v24  ;;  %802 = vmatpush.bf16.msra.mxu2 %v2120_v33  ;;  %v436_v0 = vpack.c.bf16 %v434_v55, %v434_v55  ;;  %v2164_v3 = vor.u32 %v2644_v61, %v2161_v62  ;;  %v2143_v4 = vld [vmem:[#allocation7 + $0xa8] sm:$0xf]  ;;  %v2642_v5 = vld [vmem:[#allocation7 + $0xb4] sm:$0xf0]  ;;  %v2640_v6 = vld [vmem:[#allocation7 + $0xac] sm:$0xf] }
  0x56   : > { %587 = vmatpush.bf16.msra.mxu1 %v2614_v26  ;;  %815 = vmatpush.bf16.msra.mxu3 %v2124_v37  ;;  %v2145_v7 = vld [vmem:[#allocation7 + $0xb8] sm:$0xf0]  ;;  %v2144_v8 = vor.u32 %v2642_v5, %v2143_v4  ;;  %v2127_v10 = vld [vmem:[#allocation7 + $0x88] sm:$0xf]  ;;  %v2638_v11 = vld [vmem:[#allocation7 + $0x94] sm:$0xf0] }
  0x57   : > { %v2148_v9 = vor.u32 %v2640_v6, %v2145_v7  ;;  %v2636_v12 = vld [vmem:[#allocation7 + $0x8c] sm:$0xf]  ;;  %v2129_v13 = vld [vmem:[#allocation7 + $0x98] sm:$0xf0]  ;;  %v2128_v14 = vor.u32 %v2638_v11, %v2127_v10  ;;  %v2111_v16 = vld [vmem:[#allocation7 + $0x68] sm:$0xf] }
  0x58   : > { %v2132_v15 = vor.u32 %v2636_v12, %v2129_v13  ;;  %v2634_v17 = vld [vmem:[#allocation7 + $0x74] sm:$0xf0]  ;;  %v2632_v18 = vld [vmem:[#allocation7 + $0x6c] sm:$0xf]  ;;  %v2113_v19 = vld [vmem:[#allocation7 + $0x78] sm:$0xf0] }
  0x59   : > { %575 = vmatpush.bf16.msra.mxu0 %v2605_v32  ;;  %803 = vmatpush.bf16.msra.mxu2 %v2104_v42  ;;  %v2112_v20 = vor.u32 %v2634_v17, %v2111_v16  ;;  %v2116_v21 = vor.u32 %v2632_v18, %v2113_v19  ;;  %v2095_v22 = vld [vmem:[#allocation7 + $0x48] sm:$0xf]  ;;  %v2630_v23 = vld [vmem:[#allocation7 + $0x54] sm:$0xf0]  ;;  %v2628_v24 = vld [vmem:[#allocation7 + $0x4c] sm:$0xf] }
  0x5a   : > { %588 = vmatpush.bf16.msra.mxu1 %v2613_v34  ;;  %816 = vmatpush.bf16.msra.mxu3 %v2108_v46  ;;  %v2097_v25 = vld [vmem:[#allocation7 + $0x58] sm:$0xf0]  ;;  %v2096_v26 = vor.u32 %v2630_v23, %v2095_v22  ;;  %v2071_v28 = vld [vmem:[#allocation7 + $0x20] sm:$0xf]  ;;  %v2625_v29 = vld [vmem:[#allocation7 + $0x2c] sm:$0xf0] }
  0x5b   : > { %v2100_v27 = vor.u32 %v2628_v24, %v2097_v25  ;;  %v2623_v30 = vld [vmem:[#allocation7 + $0x24] sm:$0xf]  ;;  %v2072_v31 = vor.u32 %v2625_v29, %v2071_v28  ;;  %v2073_v32 = vld [vmem:[#allocation7 + $0x30] sm:$0xf0]  ;;  %v2079_v33 = vld [vmem:[#allocation7 + $0x28] sm:$0xf] }
  0x5c   : > { %v2626_v34 = vld [vmem:[#allocation7 + $0x34] sm:$0xf0]  ;;  %v2076_v35 = vor.u32 %v2623_v30, %v2073_v32  ;;  %v2624_v37 = vld [vmem:[#allocation7 + $0x2c] sm:$0xf]  ;;  %v2081_v38 = vld [vmem:[#allocation7 + $0x38] sm:$0xf0] }
  0x5d   : > { %576 = vmatpush.bf16.msra.mxu0 %v2604_v40  ;;  %804 = vmatpush.bf16.msra.mxu2 %v2088_v51  ;;  %v2080_v36 = vor.u32 %v2626_v34, %v2079_v33  ;;  %v2084_v39 = vor.u32 %v2624_v37, %v2081_v38  ;;  %v2055_v40 = vld [vmem:[#allocation7] sm:$0xf]  ;;  %v2619_v42 = vld [vmem:[#allocation7 + $0x4] sm:$0xf]  ;;  %v2057_v44 = vld [vmem:[#allocation7 + $0x10] sm:$0xf0] }
  0x5e   : > { %589 = vmatpush.bf16.msra.mxu1 %v2612_v41  ;;  %817 = vmatpush.bf16.msra.mxu3 %v2092_v63  ;;  %v2621_v41 = vld [vmem:[#allocation7 + $0xc] sm:$0xf0]  ;;  %v2063_v45 = vld [vmem:[#allocation7 + $0x8] sm:$0xf]  ;;  %v2622_v46 = vld [vmem:[#allocation7 + $0x14] sm:$0xf0]  ;;  %v2060_v47 = vor.u32 %v2619_v42, %v2057_v44 }
  0x5f   : > { %v2056_v43 = vor.u32 %v2621_v41, %v2055_v40  ;;  %v2064_v48 = vor.u32 %v2622_v46, %v2063_v45  ;;  %v2620_v49 = vld [vmem:[#allocation7 + $0xc] sm:$0xf]  ;;  %v2674_v52 = vld [vmem:[#allocation10 + $0xb8] sm:$0xff]  ;;  %v2673_v56 = vld [vmem:[#allocation10 + $0xb0] sm:$0xff]  ;;  %s1849_s1 = sshll.u32 %s433_s28, 4  ;;  %s1850_s1 = int_to_ptr.vmem [resolvable:$true] %s1849_s1 }
  0x60   : > { %v2682_v53 = vld [vmem:[#allocation10 + $0xf8] sm:$0xff]  ;;  %v2665_v59 = vld [vmem:[#allocation10 + $0x70] sm:$0xff]  ;;  %v2672_v60 = vld [vmem:[#allocation10 + $0xa8] sm:$0xff] }
  0x61   : > { %577 = vmatpush.bf16.msra.mxu0 %v2603_v50  ;;  %805 = vmatpush.bf16.msra.mxu2 %v2072_v31  ;;  %v2065_v50 = vld [vmem:[#allocation7 + $0x18] sm:$0xf0]  ;;  %v2666_v55 = vld [vmem:[#allocation10 + $0x78] sm:$0xff]  ;;  %v2680_v61 = vld [vmem:[#allocation10 + $0xe8] sm:$0xff] }
  0x62   : > { %590 = vmatpush.bf16.msra.mxu1 %v2611_v54  ;;  %818 = vmatpush.bf16.msra.mxu3 %v2076_v35  ;;  %v2068_v51 = vor.u32 %v2620_v49, %v2065_v50  ;;  %v2658_v54 = vld [vmem:[#allocation10 + $0x38] sm:$0xff]  ;;  %v2656_v62 = vld [vmem:[#allocation10 + $0x28] sm:$0xff]  ;;  %v2667_v22 = vld [vmem:[#allocation10 + $0x80] sm:$0xff] }
  0x63   : > { %v2664_v63 = vld [vmem:[#allocation10 + $0x68] sm:$0xff]  ;;  %v2670_v4 = vld [vmem:[#allocation10 + $0x98] sm:$0xff]  ;;  %v2675_v23 = vld [vmem:[#allocation10 + $0xc0] sm:$0xff] }
  0x64   : > { %578 = vmatmul.bf16.vlgmr.msra.gmra.mxu0 %v436_v0  ;;  %v2671_v0 = vld [vmem:[#allocation10 + $0xa0] sm:$0xff]  ;;  %v2678_v5 = vld [vmem:[#allocation10 + $0xd8] sm:$0xff]  ;;  %v2668_v18 = vld [vmem:[#allocation10 + $0x88] sm:$0xff] }
  0x65   : > { %825 = vmatpush.bf16.msrb.mxu0 %v2176_v57  ;;  %591 = vmatmul.bf16.vlgmr.msra.gmra.mxu1 %v437_v1  ;;  %v2681_v57 = vld [vmem:[#allocation10 + $0xf0] sm:$0xff]  ;;  %v2679_v1 = vld [vmem:[#allocation10 + $0xe0] sm:$0xff]  ;;  %v2654_v6 = vld [vmem:[#allocation10 + $0x18] sm:$0xff] }
  0x66   : > { %838 = vmatpush.bf16.msrb.mxu1 %v2180_v58  ;;  %806 = vmatpush.bf16.msra.mxu2 %v2056_v43  ;;  %v2657_v58 = vld [vmem:[#allocation10 + $0x30] sm:$0xff]  ;;  %v2662_v7 = vld [vmem:[#allocation10 + $0x58] sm:$0xff]  ;;  %v2676_v19 = vld [vmem:[#allocation10 + $0xc8] sm:$0xff] }
  0x67   : > { %819 = vmatpush.bf16.msra.mxu3 %v2060_v47  ;;  %v2856_v10 = vld [vmem:[%s3378_s2] ss:$0 sm:$0xff]  ;;  %v2652_v24 = vld [vmem:[#allocation10 + $0x8] sm:$0xff]  ;;  %v2711_v30 = vld [vmem:[#allocation7 + $0x1e4] sm:$0xf] }
  0x68   : > { %v2660_v25 = vld [vmem:[#allocation10 + $0x48] sm:$0xff]  ;;  %v2423_v28 = vld [vmem:[#allocation7 + $0x1e0] sm:$0xf]  ;;  %v2431_v33 = vld [vmem:[#allocation7 + $0x1e8] sm:$0xf] }
  0x69   : > { %826 = vmatpush.bf16.msrb.mxu0 %v2160_v2  ;;  %v2655_v2 = vld [vmem:[#allocation10 + $0x20] sm:$0xff]  ;;  %v2713_v29 = vld [vmem:[#allocation7 + $0x1ec] sm:$0xf0]  ;;  %v2425_v32 = vld [vmem:[#allocation7 + $0x1f0] sm:$0xf0] }
  0x6a   : > { %839 = vmatpush.bf16.msrb.mxu1 %v2164_v3  ;;  %1119 = vmatpush.bf16.msrb.mxu2 %v2658_v54  ;;  %v2663_v3 = vld [vmem:[#allocation10 + $0x60] sm:$0xff]  ;;  %v2424_v31 = vor.u32 %v2713_v29, %v2423_v28  ;;  %v2714_v34 = vld [vmem:[#allocation7 + $0x1f4] sm:$0xf0]  ;;  %v2428_v35 = vor.u32 %v2711_v30, %v2425_v32  ;;  %v2433_v38 = vld [vmem:[#allocation7 + $0x1f8] sm:$0xf0] }
  0x6b   : > { %1132 = vmatpush.bf16.msrb.mxu3 %v2666_v55  ;;  %v2712_v37 = vld [vmem:[#allocation7 + $0x1ec] sm:$0xf]  ;;  %v2709_v41 = vld [vmem:[#allocation7 + $0x1cc] sm:$0xf0]  ;;  %v2707_v42 = vld [vmem:[#allocation7 + $0x1c4] sm:$0xf] }
  0x6c   : > { %v2436_v40 = vor.u32 %v2712_v37, %v2433_v38  ;;  %v2409_v43 = vld [vmem:[#allocation7 + $0x1d0] sm:$0xf0]  ;;  %v2415_v46 = vld [vmem:[#allocation7 + $0x1c8] sm:$0xf]  ;;  %v2710_v47 = vld [vmem:[#allocation7 + $0x1d4] sm:$0xf0] }
  0x6d   : > { %827 = vmatpush.bf16.msrb.mxu0 %v2144_v8  ;;  %v2669_v8 = vld [vmem:[#allocation10 + $0x90] sm:$0xff]  ;;  %v2412_v45 = vor.u32 %v2707_v42, %v2409_v43  ;;  %v2416_v49 = vor.u32 %v2710_v47, %v2415_v46  ;;  %v2699_v28 = vld [vmem:[#allocation7 + $0x184] sm:$0xf]  ;;  %v2377_v29 = vld [vmem:[#allocation7 + $0x190] sm:$0xf0] }
  0x6e   : > { %840 = vmatpush.bf16.msrb.mxu1 %v2148_v9  ;;  %1120 = vmatpush.bf16.msrb.mxu2 %v2657_v58  ;;  %v2677_v9 = vld [vmem:[#allocation10 + $0xd0] sm:$0xff]  ;;  %v2383_v32 = vld [vmem:[#allocation7 + $0x188] sm:$0xf]  ;;  %v2359_v38 = vld [vmem:[#allocation7 + $0x160] sm:$0xf] }
  0x6f   : > { %1133 = vmatpush.bf16.msrb.mxu3 %v2665_v59  ;;  %v2417_v50 = vld [vmem:[#allocation7 + $0x1d8] sm:$0xf0]  ;;  %v2361_v42 = vld [vmem:[#allocation7 + $0x170] sm:$0xf0]  ;;  %v2367_v43 = vld [vmem:[#allocation7 + $0x168] sm:$0xf] }
  0x70   : > { %v2696_v47 = vld [vmem:[#allocation7 + $0x16c] sm:$0xf] }
  0x71   : > { %828 = vmatpush.bf16.msrb.mxu0 %v2128_v14 }
  0x72   : > { %841 = vmatpush.bf16.msrb.mxu1 %v2132_v15  ;;  %1121 = vmatpush.bf16.msrb.mxu2 %v2656_v62 }
  0x73   : > { %1134 = vmatpush.bf16.msrb.mxu3 %v2664_v63 }
  0x75   : > { %829 = vmatpush.bf16.msrb.mxu0 %v2112_v20  ;;  %v2653_v20 = vld [vmem:[#allocation10 + $0x10] sm:$0xff] }
  0x76   : > { %842 = vmatpush.bf16.msrb.mxu1 %v2116_v21  ;;  %1122 = vmatpush.bf16.msrb.mxu2 %v2655_v2  ;;  %v2661_v21 = vld [vmem:[#allocation10 + $0x50] sm:$0xff] }
  0x77   : > { %1135 = vmatpush.bf16.msrb.mxu3 %v2663_v3 }
  0x79   : > { %830 = vmatpush.bf16.msrb.mxu0 %v2096_v26  ;;  %v2651_v26 = vld [vmem:[#allocation10] sm:$0xff] }
  0x7a   : > { %843 = vmatpush.bf16.msrb.mxu1 %v2100_v27  ;;  %1123 = vmatpush.bf16.msrb.mxu2 %v2654_v6  ;;  %v2659_v27 = vld [vmem:[#allocation10 + $0x40] sm:$0xff] }
  0x7b   : > { %1136 = vmatpush.bf16.msrb.mxu3 %v2662_v7 }
  0x7d   : > { %831 = vmatpush.bf16.msrb.mxu0 %v2080_v36  ;;  %v2432_v36 = vor.u32 %v2714_v34, %v2431_v33  ;;  %v2702_v33 = vld [vmem:[#allocation7 + $0x194] sm:$0xf0]  ;;  %v2700_v34 = vld [vmem:[#allocation7 + $0x18c] sm:$0xf] }
  0x7e   : > { %844 = vmatpush.bf16.msrb.mxu1 %v2084_v39  ;;  %1124 = vmatpush.bf16.msrb.mxu2 %v2653_v20  ;;  %v2407_v39 = vld [vmem:[#allocation7 + $0x1c0] sm:$0xf]  ;;  %v2706_v20 = vld [vmem:[#allocation7 + $0x1b4] sm:$0xf0] }
  0x7f   : > { %1137 = vmatpush.bf16.msrb.mxu3 %v2661_v21  ;;  %v2408_v44 = vor.u32 %v2709_v41, %v2407_v39  ;;  %v2697_v39 = vld [vmem:[#allocation7 + $0x16c] sm:$0xf0] }
  0x80   : > { %v2360_v41 = vor.u32 %v2697_v39, %v2359_v38  ;;  %v2743_v38 = vld [vmem:[#allocation10 + $0x1e0] sm:$0xff] }
  0x81   : > { %832 = vmatpush.bf16.msrb.mxu0 %v2064_v48  ;;  %v2708_v48 = vld [vmem:[#allocation7 + $0x1cc] sm:$0xf] }
  0x82   : > { %845 = vmatpush.bf16.msrb.mxu1 %v2068_v51  ;;  %1125 = vmatpush.bf16.msrb.mxu2 %v2652_v24  ;;  %v2420_v51 = vor.u32 %v2708_v48, %v2417_v50  ;;  %v2401_v24 = vld [vmem:[#allocation7 + $0x1b8] sm:$0xf0]  ;;  %v2343_v50 = vld [vmem:[#allocation7 + $0x140] sm:$0xf]  ;;  %v2719_v39 = vld [vmem:[#allocation10 + $0x120] sm:$0xff] }
  0x83   : > { %1138 = vmatpush.bf16.msrb.mxu3 %v2660_v25  ;;  %v2375_v25 = vld [vmem:[#allocation7 + $0x180] sm:$0xf]  ;;  %v2369_v48 = vld [vmem:[#allocation7 + $0x178] sm:$0xf0] }
  0x85   : > { %1145 = vmatpush.bf16.msra.mxu0 %v2674_v52  ;;  %v629_v52 = vld [vmem:[#allocation8] sm:$0xf] }
  0x86   : > { %1158 = vmatpush.bf16.msra.mxu1 %v2682_v53  ;;  %1126 = vmatpush.bf16.msrb.mxu2 %v2651_v26  ;;  %v633_v53 = vperm.slane %v629_v52, 2  ;;  %v634_v54 = vperm.slane %v629_v52, 3  ;;  %v631_v59 = vperm.slane %v629_v52, 0 }
  0x87   : > { %1139 = vmatpush.bf16.msrb.mxu3 %v2659_v27  ;;  %v2701_v27 = vld [vmem:[#allocation7 + $0x18c] sm:$0xf0] }
  0x88   : > { %v2376_v30 = vor.u32 %v2701_v27, %v2375_v25  ;;  %v2722_v25 = vld [vmem:[#allocation10 + $0x138] sm:$0xff]  ;;  %v2737_v27 = vld [vmem:[#allocation10 + $0x1b0] sm:$0xff] }
  0x89   : > { %1146 = vmatpush.bf16.msra.mxu0 %v2673_v56 }
  0x8a   : > { %1159 = vmatpush.bf16.msra.mxu1 %v2681_v57 }
  0x8d   : > { %1147 = vmatpush.bf16.msra.mxu0 %v2672_v60  ;;  %v632_v60 = vperm.slane %v629_v52, 1  ;;  %v2691_v52 = vld [vmem:[#allocation7 + $0x144] sm:$0xf] }
  0x8e   : > { %1160 = vmatpush.bf16.msra.mxu1 %v2680_v61 }
  0x91   : > { %1148 = vmatpush.bf16.msra.mxu0 %v2671_v0 }
  0x92   : > { %1161 = vmatpush.bf16.msra.mxu1 %v2679_v1 }
  0x95   : > { %1149 = vmatpush.bf16.msra.mxu0 %v2670_v4 }
  0x96   : > { %1162 = vmatpush.bf16.msra.mxu1 %v2678_v5 }
  0x99   : > { %1150 = vmatpush.bf16.msra.mxu0 %v2669_v8 }
  0x9a   : > { %1163 = vmatpush.bf16.msra.mxu1 %v2677_v9 }
  0x9d   : > { %1151 = vmatpush.bf16.msra.mxu0 %v2668_v18  ;;  %v2393_v18 = vld [vmem:[#allocation7 + $0x1b0] sm:$0xf0] }
  0x9e   : > { %1164 = vmatpush.bf16.msra.mxu1 %v2676_v19  ;;  %v2399_v19 = vld [vmem:[#allocation7 + $0x1a8] sm:$0xf] }
  0xa1   : > { %1152 = vmatpush.bf16.msra.mxu0 %v2667_v22  ;;  %v2400_v22 = vor.u32 %v2706_v20, %v2399_v19  ;;  %v2684_v20 = vld [vmem:[#allocation7 + $0x10c] sm:$0xf] }
  0xa2   : > { %1165 = vmatpush.bf16.msra.mxu1 %v2675_v23  ;;  %v2704_v23 = vld [vmem:[#allocation7 + $0x1ac] sm:$0xf] }
  0xa3   : > { %v2404_v26 = vor.u32 %v2704_v23, %v2401_v24  ;;  %v2738_v23 = vld [vmem:[#allocation10 + $0x1b8] sm:$0xff] }
  0xa4   : > { %v2746_v24 = vld [vmem:[#allocation10 + $0x1f8] sm:$0xff] }
  0xe1   : > { %v579_v11 = vpop.f32.mrf.mxu0 }
  0xe2   : > { %v592_v12 = vpop.f32.mrf.mxu1  ;;  %v580_v13 = vadd.f32 %v2856_v10, %v579_v11 }
  0xe4   : > { %v3323_v14 = vadd.f32 %v592_v12, %v580_v13  ;;  %v2391_v13 = vld [vmem:[#allocation7 + $0x1a0] sm:$0xf] }
  0xe6   : > { %v596_v15 = vpack.c.bf16 %v3323_v14, %v3323_v14 }
  0xe8   : > { %807 = vmatmul.bf16.vlgmr.msra.gmra.mxu2 %v596_v15  ;;  %820 = vmatmul.bf16.vlgmr.msra.gmra.mxu3 %v596_v15 }
  0xe9   : > { %833 = vmatmul.bf16.vlgmr.msrb.gmra.mxu0 %v596_v15  ;;  %846 = vmatmul.bf16.vlgmr.msrb.gmra.mxu1 %v596_v15  ;;  %v581_v16 = vpop.f32.mrf.mxu0  ;;  %v2705_v15 = vld [vmem:[#allocation7 + $0x1ac] sm:$0xf0] }
  0xea   : > { %v594_v17 = vpop.f32.mrf.mxu1  ;;  %1377 = vmatpush.bf16.msra.mxu2 %v2424_v31  ;;  %1390 = vmatpush.bf16.msra.mxu3 %v2428_v35  ;;  %v2703_v16 = vld [vmem:[#allocation7 + $0x1a4] sm:$0xf]  ;;  %v2380_v31 = vor.u32 %v2699_v28, %v2377_v29  ;;  %v2384_v35 = vor.u32 %v2702_v33, %v2383_v32  ;;  %v2745_v28 = vld [vmem:[#allocation10 + $0x1f0] sm:$0xff]  ;;  %v2744_v32 = vld [vmem:[#allocation10 + $0x1e8] sm:$0xff] }
  0xeb   : > { %1403 = vmatpush.bf16.msrb.mxu0 %v2432_v36  ;;  %1416 = vmatpush.bf16.msrb.mxu1 %v2436_v40  ;;  %v2392_v17 = vor.u32 %v2705_v15, %v2391_v13  ;;  %v2396_v21 = vor.u32 %v2703_v16, %v2393_v18  ;;  %v2385_v36 = vld [vmem:[#allocation7 + $0x198] sm:$0xf0]  ;;  %v2695_v40 = vld [vmem:[#allocation7 + $0x164] sm:$0xf]  ;;  %v2313_v15 = vld [vmem:[#allocation7 + $0x110] sm:$0xf0] }
  0xec   : > { %v2388_v37 = vor.u32 %v2700_v34, %v2385_v36  ;;  %v2319_v16 = vld [vmem:[#allocation7 + $0x108] sm:$0xf]  ;;  %v2721_v29 = vld [vmem:[#allocation10 + $0x130] sm:$0xff]  ;;  %v2728_v36 = vld [vmem:[#allocation10 + $0x168] sm:$0xff] }
  0xee   : > { %1378 = vmatpush.bf16.msra.mxu2 %v2408_v44  ;;  %1391 = vmatpush.bf16.msra.mxu3 %v2412_v45  ;;  %v2698_v44 = vld [vmem:[#allocation7 + $0x174] sm:$0xf0]  ;;  %v2364_v45 = vor.u32 %v2695_v40, %v2361_v42  ;;  %v2727_v40 = vld [vmem:[#allocation10 + $0x160] sm:$0xff]  ;;  %v2742_v42 = vld [vmem:[#allocation10 + $0x1d8] sm:$0xff] }
  0xef   : > { %1404 = vmatpush.bf16.msrb.mxu0 %v2416_v49  ;;  %1417 = vmatpush.bf16.msrb.mxu1 %v2420_v51  ;;  %v2368_v46 = vor.u32 %v2698_v44, %v2367_v43  ;;  %v2372_v49 = vor.u32 %v2696_v47, %v2369_v48  ;;  %v2693_v51 = vld [vmem:[#allocation7 + $0x14c] sm:$0xf0]  ;;  %v2726_v47 = vld [vmem:[#allocation10 + $0x158] sm:$0xff] }
  0xf2   : > { %1379 = vmatpush.bf16.msra.mxu2 %v2392_v17  ;;  %1392 = vmatpush.bf16.msra.mxu3 %v2396_v21  ;;  %v2686_v17 = vld [vmem:[#allocation7 + $0x114] sm:$0xf0]  ;;  %v2321_v21 = vld [vmem:[#allocation7 + $0x118] sm:$0xf0] }
  0xf3   : > { %1405 = vmatpush.bf16.msrb.mxu0 %v2400_v22  ;;  %1418 = vmatpush.bf16.msrb.mxu1 %v2404_v26  ;;  %v2320_v19 = vor.u32 %v2686_v17, %v2319_v16  ;;  %v2324_v22 = vor.u32 %v2684_v20, %v2321_v21  ;;  %v2730_v26 = vld [vmem:[#allocation10 + $0x178] sm:$0xff] }
  0xf6   : > { %1380 = vmatpush.bf16.msra.mxu2 %v2376_v30  ;;  %1393 = vmatpush.bf16.msra.mxu3 %v2380_v31  ;;  %v2729_v30 = vld [vmem:[#allocation10 + $0x170] sm:$0xff]  ;;  %v2736_v31 = vld [vmem:[#allocation10 + $0x1a8] sm:$0xff] }
  0xf7   : > { %1406 = vmatpush.bf16.msrb.mxu0 %v2384_v35  ;;  %1419 = vmatpush.bf16.msrb.mxu1 %v2388_v37  ;;  %v2720_v35 = vld [vmem:[#allocation10 + $0x128] sm:$0xff]  ;;  %v2735_v37 = vld [vmem:[#allocation10 + $0x1a0] sm:$0xff] }
  0xfa   : > { %1381 = vmatpush.bf16.msra.mxu2 %v2360_v41  ;;  %1394 = vmatpush.bf16.msra.mxu3 %v2364_v45  ;;  %v2734_v41 = vld [vmem:[#allocation10 + $0x198] sm:$0xff] }
  0xfb   : > { %1407 = vmatpush.bf16.msrb.mxu0 %v2368_v46  ;;  %1420 = vmatpush.bf16.msrb.mxu1 %v2372_v49  ;;  %v2857_v45 = vld [vmem:[%s3382_s6] ss:$0 sm:$0xff] }
  0xfc   : > { %v2718_v46 = vld [vmem:[#allocation10 + $0x118] sm:$0xff] }
 0x166   : > { %v834_v55 = vpop.f32.mrf.mxu0  ;;  %v847_v56 = vpop.f32.mrf.mxu1 }
 0x167   : > { %v835_v57 = vadd.f32 %v834_v55, %v633_v53  ;;  %v848_v58 = vadd.f32 %v847_v56, %v634_v54  ;;  %v2344_v53 = vor.u32 %v2693_v51, %v2343_v50  ;;  %v2345_v54 = vld [vmem:[#allocation7 + $0x150] sm:$0xf0]  ;;  %v2351_v55 = vld [vmem:[#allocation7 + $0x148] sm:$0xf]  ;;  %v2694_v56 = vld [vmem:[#allocation7 + $0x154] sm:$0xf0] }
 0x168   : > { %v2733_v50 = vld [vmem:[#allocation10 + $0x190] sm:$0xff] }
 0x169   : > { %v853_v61 = vmax.f32 %v835_v57, 0.0  ;;  %v854_v62 = vmax.f32 %v848_v58, 0.0  ;;  %v2348_v57 = vor.u32 %v2691_v52, %v2345_v54  ;;  %v2352_v58 = vor.u32 %v2694_v56, %v2351_v55  ;;  %1382 = vmatpush.bf16.msra.mxu2 %v2344_v53  ;;  %v2741_v51 = vld [vmem:[#allocation10 + $0x1d0] sm:$0xff] }
 0x16b   : > { %v857_v63 = vpack.c.bf16 %v853_v61, %v853_v61  ;;  %v858_v0 = vpack.c.bf16 %v854_v62, %v854_v62  ;;  %v808_v1 = vpop.f32.mrf.mxu2  ;;  %v821_v2 = vpop.f32.mrf.mxu3  ;;  %1395 = vmatpush.bf16.msra.mxu3 %v2348_v57  ;;  %1408 = vmatpush.bf16.msrb.mxu0 %v2352_v58  ;;  %v2327_v62 = vld [vmem:[#allocation7 + $0x120] sm:$0xf] }
 0x16c   : > { %v809_v3 = vadd.f32 %v808_v1, %v631_v59  ;;  %v822_v4 = vadd.f32 %v821_v2, %v632_v60  ;;  %v2692_v59 = vld [vmem:[#allocation7 + $0x14c] sm:$0xf]  ;;  %v2353_v60 = vld [vmem:[#allocation7 + $0x158] sm:$0xf0]  ;;  %v2329_v2 = vld [vmem:[#allocation7 + $0x130] sm:$0xf0] }
 0x16d   : > { %1153 = vmatmul.bf16.vlgmr.msra.gmra.mxu0 %v857_v63  ;;  %1166 = vmatmul.bf16.vlgmr.msra.gmra.mxu1 %v858_v0  ;;  %v2356_v61 = vor.u32 %v2692_v59, %v2353_v60  ;;  %v2689_v63 = vld [vmem:[#allocation7 + $0x12c] sm:$0xf0]  ;;  %v2687_v0 = vld [vmem:[#allocation7 + $0x124] sm:$0xf] }
 0x16e   : > { %v851_v5 = vmax.f32 %v809_v3, 0.0  ;;  %v852_v6 = vmax.f32 %v822_v4, 0.0  ;;  %v836_v7 = vpop.f32.mrf.mxu0  ;;  %v849_v8 = vpop.f32.mrf.mxu1  ;;  %v2328_v1 = vor.u32 %v2689_v63, %v2327_v62  ;;  %v2335_v3 = vld [vmem:[#allocation7 + $0x128] sm:$0xf]  ;;  %v2690_v4 = vld [vmem:[#allocation7 + $0x134] sm:$0xf0] }
 0x16f   : > { %1421 = vmatpush.bf16.msrb.mxu1 %v2356_v61  ;;  %v2688_v7 = vld [vmem:[#allocation7 + $0x12c] sm:$0xf]  ;;  %v2337_v8 = vld [vmem:[#allocation7 + $0x138] sm:$0xf0]  ;;  %v2732_v60 = vld [vmem:[#allocation10 + $0x188] sm:$0xff] }
 0x170   : > { %v855_v9 = vpack.c.bf16 %v851_v5, %v851_v5  ;;  %v856_v10 = vpack.c.bf16 %v852_v6, %v852_v6  ;;  %v2332_v5 = vor.u32 %v2687_v0, %v2329_v2  ;;  %v2336_v6 = vor.u32 %v2690_v4, %v2335_v3  ;;  %1383 = vmatpush.bf16.msra.mxu2 %v2328_v1  ;;  %v2740_v61 = vld [vmem:[#allocation10 + $0x1c8] sm:$0xff]  ;;  %v2717_v62 = vld [vmem:[#allocation10 + $0x110] sm:$0xff]  ;;  %v2731_v0 = vld [vmem:[#allocation10 + $0x180] sm:$0xff] }
 0x171   : > { %v2725_v63 = vld [vmem:[#allocation10 + $0x150] sm:$0xff]  ;;  %v2739_v1 = vld [vmem:[#allocation10 + $0x1c0] sm:$0xff]  ;;  %v2724_v2 = vld [vmem:[#allocation10 + $0x148] sm:$0xff] }
 0x172   : > { %1127 = vmatmul.bf16.vlgmr.msrb.gmra.mxu2 %v855_v9  ;;  %1140 = vmatmul.bf16.vlgmr.msrb.gmra.mxu3 %v856_v10  ;;  %v2340_v9 = vor.u32 %v2688_v7, %v2337_v8  ;;  %v2311_v10 = vld [vmem:[#allocation7 + $0x100] sm:$0xf]  ;;  %v2715_v3 = vld [vmem:[#allocation10 + $0x100] sm:$0xff] }
 0x173   : > { %v810_v11 = vpop.f32.mrf.mxu2  ;;  %v823_v12 = vpop.f32.mrf.mxu3  ;;  %1396 = vmatpush.bf16.msra.mxu3 %v2332_v5  ;;  %1409 = vmatpush.bf16.msrb.mxu0 %v2336_v6  ;;  %v2723_v4 = vld [vmem:[#allocation10 + $0x140] sm:$0xff]  ;;  %v2754_v5 = vld [vmem:[#allocation11 + $0x38] sm:$0xff] }
 0x174   : > { %v2685_v11 = vld [vmem:[#allocation7 + $0x10c] sm:$0xf0]  ;;  %v2683_v12 = vld [vmem:[#allocation7 + $0x104] sm:$0xf]  ;;  %1422 = vmatpush.bf16.msrb.mxu1 %v2340_v9 }
 0x175   : > { %v2312_v13 = vor.u32 %v2685_v11, %v2311_v10  ;;  %v2316_v18 = vor.u32 %v2683_v12, %v2313_v15  ;;  %v1207_v6 = vld [vmem:[#allocation8 + $0x4] sm:$0xf] }
 0x176   : > { %v1211_v7 = vperm.slane %v1207_v6, 2  ;;  %v1212_v8 = vperm.slane %v1207_v6, 3  ;;  %v1210_v15 = vperm.slane %v1207_v6, 1 }
 0x177   : > { %1384 = vmatpush.bf16.msra.mxu2 %v2312_v13  ;;  %1397 = vmatpush.bf16.msra.mxu3 %v2316_v18  ;;  %v1209_v13 = vperm.slane %v1207_v6, 0 }
 0x178   : > { %1410 = vmatpush.bf16.msrb.mxu0 %v2320_v19  ;;  %1423 = vmatpush.bf16.msrb.mxu1 %v2324_v22 }
 0x17b   : > { %1699 = vmatpush.bf16.msrb.mxu2 %v2722_v25  ;;  %1712 = vmatpush.bf16.msrb.mxu3 %v2730_v26 }
 0x17c   : > { %1725 = vmatpush.bf16.msra.mxu0 %v2738_v23  ;;  %1738 = vmatpush.bf16.msra.mxu1 %v2746_v24 }
 0x17f   : > { %1700 = vmatpush.bf16.msrb.mxu2 %v2721_v29  ;;  %1713 = vmatpush.bf16.msrb.mxu3 %v2729_v30 }
 0x180   : > { %1726 = vmatpush.bf16.msra.mxu0 %v2737_v27  ;;  %1739 = vmatpush.bf16.msra.mxu1 %v2745_v28 }
 0x183   : > { %1701 = vmatpush.bf16.msrb.mxu2 %v2720_v35  ;;  %1714 = vmatpush.bf16.msrb.mxu3 %v2728_v36  ;;  %v2750_v35 = vld [vmem:[#allocation11 + $0x18] sm:$0xff]  ;;  %v2749_v36 = vld [vmem:[#allocation11 + $0x10] sm:$0xff] }
 0x184   : > { %1727 = vmatpush.bf16.msra.mxu0 %v2736_v31  ;;  %1740 = vmatpush.bf16.msra.mxu1 %v2744_v32  ;;  %v2753_v32 = vld [vmem:[#allocation11 + $0x30] sm:$0xff] }
 0x187   : > { %1702 = vmatpush.bf16.msrb.mxu2 %v2719_v39  ;;  %1715 = vmatpush.bf16.msrb.mxu3 %v2727_v40 }
 0x188   : > { %1728 = vmatpush.bf16.msra.mxu0 %v2735_v37  ;;  %1741 = vmatpush.bf16.msra.mxu1 %v2743_v38  ;;  %v2748_v37 = vld [vmem:[#allocation11 + $0x8] sm:$0xff]  ;;  %v2747_v38 = vld [vmem:[#allocation11] sm:$0xff] }
 0x18b   : > { %1703 = vmatpush.bf16.msrb.mxu2 %v2718_v46  ;;  %1716 = vmatpush.bf16.msrb.mxu3 %v2726_v47 }
 0x18c   : > { %1729 = vmatpush.bf16.msra.mxu0 %v2734_v41  ;;  %1742 = vmatpush.bf16.msra.mxu1 %v2742_v42 }
 0x18f   : > { %1704 = vmatpush.bf16.msrb.mxu2 %v2717_v62  ;;  %1717 = vmatpush.bf16.msrb.mxu3 %v2725_v63 }
 0x190   : > { %1730 = vmatpush.bf16.msra.mxu0 %v2733_v50  ;;  %1743 = vmatpush.bf16.msra.mxu1 %v2741_v51 }
 0x193   : > { %1718 = vmatpush.bf16.msrb.mxu3 %v2724_v2 }
 0x194   : > { %1731 = vmatpush.bf16.msra.mxu0 %v2732_v60  ;;  %1744 = vmatpush.bf16.msra.mxu1 %v2740_v61 }
 0x197   : > { %1719 = vmatpush.bf16.msrb.mxu3 %v2723_v4 }
 0x198   : > { %1732 = vmatpush.bf16.msra.mxu0 %v2731_v0  ;;  %1745 = vmatpush.bf16.msra.mxu1 %v2739_v1 }
 0x1ea   : > { %v1154_v33 = vpop.f32.mrf.mxu0  ;;  %v1167_v34 = vpop.f32.mrf.mxu1 }
 0x1f2   : > { %v1156_v43 = vpop.f32.mrf.mxu0  ;;  %v1169_v44 = vpop.f32.mrf.mxu1 }
 0x1f3   : > { %v2858_v43 = vld [vmem:[%s3382_s6 + $0x1] ss:$0 sm:$0xff] }
 0x1f5   : > { %v1128_v48 = vpop.f32.mrf.mxu2  ;;  %v1141_v49 = vpop.f32.mrf.mxu3 }
 0x1f6   : > { %v1129_v52 = vadd.f32 %v2857_v45, %v1128_v48 }
 0x1f8   : > { %v1142_v53 = vadd.f32 %v1141_v49, %v1129_v52 }
 0x1fa   : > { %v1155_v54 = vadd.f32 %v1154_v33, %v1142_v53  ;;  %v2752_v33 = vld [vmem:[#allocation11 + $0x28] sm:$0xff] }
 0x1fc   : > { %v1168_v55 = vadd.f32 %v1167_v34, %v1155_v54  ;;  %v2751_v34 = vld [vmem:[#allocation11 + $0x20] sm:$0xff] }
 0x1fd   : > { %v1130_v56 = vpop.f32.mrf.mxu2  ;;  %v1143_v57 = vpop.f32.mrf.mxu3 }
 0x1fe   : > { %v3331_v58 = vadd.f32 %v1168_v55, %v3323_v14  ;;  %v2716_v14 = vld [vmem:[#allocation10 + $0x108] sm:$0xff]  ;;  %v2859_v55 = vld [vmem:[%s3384_s8] ss:$0 sm:$0xff] }
 0x1ff   : > { %1705 = vmatpush.bf16.msrb.mxu2 %v2716_v14 }
 0x200   : > { %v1172_v59 = vpack.c.bf16 %v3331_v58, %v3331_v58 }
 0x202   : > { %1385 = vmatmul.bf16.vlgmr.msra.gmra.mxu2 %v1172_v59  ;;  %1398 = vmatmul.bf16.vlgmr.msra.gmra.mxu3 %v1172_v59 }
 0x203   : > { %1411 = vmatmul.bf16.vlgmr.msrb.gmra.mxu0 %v1172_v59  ;;  %1424 = vmatmul.bf16.vlgmr.msrb.gmra.mxu1 %v1172_v59 }
 0x204   : > { %1706 = vmatpush.bf16.msrb.mxu2 %v2715_v3 }
 0x208   : > { %1822 = vmatpush.bf16.msra.mxu2 %v2754_v5 }
 0x20c   : > { %1823 = vmatpush.bf16.msra.mxu2 %v2753_v32 }
 0x210   : > { %1824 = vmatpush.bf16.msra.mxu2 %v2752_v33 }
 0x214   : > { %1825 = vmatpush.bf16.msra.mxu2 %v2751_v34 }
 0x218   : > { %1826 = vmatpush.bf16.msra.mxu2 %v2750_v35 }
 0x21c   : > { %1827 = vmatpush.bf16.msra.mxu2 %v2749_v36 }
 0x220   : > { %1828 = vmatpush.bf16.msra.mxu2 %v2748_v37 }
 0x224   : > { %1829 = vmatpush.bf16.msra.mxu2 %v2747_v38 }
 0x280   : > { %v1412_v9 = vpop.f32.mrf.mxu0  ;;  %v1425_v10 = vpop.f32.mrf.mxu1 }
 0x281   : > { %v1413_v11 = vadd.f32 %v1412_v9, %v1211_v7  ;;  %v1426_v12 = vadd.f32 %v1425_v10, %v1212_v8 }
 0x283   : > { %v1431_v16 = vmax.f32 %v1413_v11, 0.0  ;;  %v1432_v17 = vmax.f32 %v1426_v12, 0.0 }
 0x285   : > { %v1435_v18 = vpack.c.bf16 %v1431_v16, %v1431_v16  ;;  %v1436_v19 = vpack.c.bf16 %v1432_v17, %v1432_v17  ;;  %v1386_v20 = vpop.f32.mrf.mxu2  ;;  %v1399_v21 = vpop.f32.mrf.mxu3 }
 0x286   : > { %v1387_v22 = vadd.f32 %v1386_v20, %v1209_v13  ;;  %v1400_v23 = vadd.f32 %v1399_v21, %v1210_v15 }
 0x287   : > { %1733 = vmatmul.bf16.vlgmr.msra.gmra.mxu0 %v1435_v18  ;;  %1746 = vmatmul.bf16.vlgmr.msra.gmra.mxu1 %v1436_v19 }
 0x288   : > { %v1429_v24 = vmax.f32 %v1387_v22, 0.0  ;;  %v1430_v25 = vmax.f32 %v1400_v23, 0.0  ;;  %v1414_v26 = vpop.f32.mrf.mxu0  ;;  %v1427_v27 = vpop.f32.mrf.mxu1 }
 0x28a   : > { %v1433_v28 = vpack.c.bf16 %v1429_v24, %v1429_v24  ;;  %v1434_v29 = vpack.c.bf16 %v1430_v25, %v1430_v25 }
 0x28c   : > { %1707 = vmatmul.bf16.vlgmr.msrb.gmra.mxu2 %v1433_v28  ;;  %1720 = vmatmul.bf16.vlgmr.msrb.gmra.mxu3 %v1434_v29 }
 0x28d   : > { %v1388_v30 = vpop.f32.mrf.mxu2  ;;  %v1401_v31 = vpop.f32.mrf.mxu3 }
 0x304   : > { %v1734_v39 = vpop.f32.mrf.mxu0  ;;  %v1747_v40 = vpop.f32.mrf.mxu1 }
 0x30c   : > { %v1736_v41 = vpop.f32.mrf.mxu0  ;;  %v1749_v42 = vpop.f32.mrf.mxu1 }
 0x30f   : > { %v1708_v44 = vpop.f32.mrf.mxu2  ;;  %v1721_v45 = vpop.f32.mrf.mxu3 }
 0x310   : > { %v1709_v46 = vadd.f32 %v2858_v43, %v1708_v44 }
 0x312   : > { %v1722_v47 = vadd.f32 %v1721_v45, %v1709_v46 }
 0x314   : > { %v1735_v48 = vadd.f32 %v1734_v39, %v1722_v47 }
 0x316   : > { %v1748_v49 = vadd.f32 %v1747_v40, %v1735_v48 }
 0x317   : > { %v1710_v50 = vpop.f32.mrf.mxu2  ;;  %v1723_v51 = vpop.f32.mrf.mxu3 }
 0x318   : > { %v1751_v52 = vadd.f32 %v1748_v49, %v3331_v58 }
 0x31a   : > { %v1752_v53 = vmax.f32 %v1751_v52, 0.0 }
 0x31c   : > { %v1753_v54 = vpack.c.bf16 %v1752_v53, %v1752_v53 }
 0x31e   : > { %1830 = vmatmul.bf16.vlgmr.msra.gmra.mxu2 %v1753_v54 }
 0x3a1   : > { %v1831_v56 = vpop.f32.mrf.mxu2 }
 0x3a2   : > { %v1832_v57 = vadd.f32 %v2859_v55, %v1831_v56 }
 0x3a4   : > { %1835 = vst [vmem:[%s433_s28] sm:$0xff] %v1832_v57 }
 0x3a5   : > { %3067 = shalt.err (!%p3064_p9)
}
 0x3a6   : > { %2777 = dma.vmem_to_hbm [thread:$0]  (%p3265_p13), %s1850_s1, 128, %s1852_s3, %s1837_s4  }
 0x3a9   : > { %v1833_v58 = vpop.f32.mrf.mxu2 }
 0x3aa PF: > { %s1863_s13 = sand.u32 1, %s3106_s30   ;;  %p3398_p10 = scmp.ge.s32.totalorder %s3118_s12, 2 }
 0x3ab   : > { %s1864_s14 = scalar_lea.sflag [#allocation4], %s1863_s13 }
 0x3ac   : > { %p2800_p11 = pnand %p3398_p10, %p3270_p4 }
 0x3ae   : > { %p2801_p0 = pneg %p2800_p11 }
 0x3b0   : > { %3101 = dma.done.wait (%p2801_p0), %s1864_s14, 128  }
 0x3b1   : > { %3103 = vsyncadd (%p2801_p0), %s1864_s14, 4294967168  ;;  %p25_p2 = scmp.ge.s32.totalorder %s3245_s21, 4   ;;  %s3399_s30 = smov %s3110_s10 }
 0x3b2   : > { %s3400_s10 = smov %s3114_s11  ;;  %s3401_s11 = smov %s3257_s24 }
 0x3b3   : > { %s3402_s12 = smov %s3245_s21  ;;  %27 = sbr.rel (!%p25_p2) target bundleno = 12 (0xc), region = 125 }
 0x3b8   :  { %1870 = vsyncpa [#allocation3], 1 }
 0x3b9   :  { %1872 = vsyncpa [#allocation3 + $0x1], 1 }
 0x3ba   :  { %1873 = vsyncpa [#allocation6], 1 }
 0x3bb   :  { %1874 = vsyncpa [#allocation9], 1 }
 0x3bc   :  { %1875 = vsyncpa [#allocation12], 1 }
 0x3bd   :  { %1876 = vsyncpa [#allocation4], 1 }
 0x3be   :  { %1878 = vsyncpa [#allocation4 + $0x1], 1 }

// kernel: tpu_custom_call.1
= control target key start
LH: loop header
LB: loop body
LE: loop exit
PB: predicated region body
PF: predicated region fallthrough
CT: control target
= control target key end

     0   :  { %s3376_s0 = inlined_call_operand.hbm [shape: f32[16,256], index: 0, kind: input, shape index: {}]   ;;  %s3377_s1 = inlined_call_operand.hbm [shape: bf16[256,128], index: 1, kind: input, shape index: {}]   ;;  %s3378_s2 = inlined_call_operand.vmem [shape: f32[1,128], index: 2, kind: input, shape index: {}]   ;;  %s3379_s3 = inlined_call_operand.hbm [shape: bf16[2,128,512], index: 3, kind: input, shape index: {}]   ;;  %s3380_s4 = inlined_call_operand.hbm [shape: f32[2,1,512], index: 4, kind: input, shape index: {}]   ;;  %s3381_s5 = inlined_call_operand.hbm [shape: bf16[2,512,128], index: 5, kind: input, shape index: {}]   ;;  %s3382_s6 = inlined_call_operand.vmem [shape: f32[2,1,128], index: 6, kind: input, shape index: {}]   ;;  %s3383_s7 = inlined_call_operand.hbm [shape: bf16[128,128], index: 7, kind: input, shape index: {}]   ;;  %s3384_s8 = inlined_call_operand.vmem [shape: f32[1,128], index: 8, kind: input, shape index: {}]   ;;  %s3385_s9 = inlined_call_operand.hbm [shape: f32[16,128], index: 9, kind: output, shape index: {}]  }
   0x1   :  { %3386 = sst [smem:[#allocation19_spill]] %s3377_s1 }
   0x2   :  { %3387 = sst [smem:[#allocation20_spill]] %s3379_s3 }
   0x3   :  { %3388 = sst [smem:[#allocation21_spill]] %s3380_s4 }
   0x4   :  { %14 = vsyncpa [#allocation3], 0 }
   0x5   :  { %16 = vsyncpa [#allocation3 + $0x1], 0 }
   0x6   :  { %17 = vsyncpa [#allocation6], 0 }
   0x7   :  { %18 = vsyncpa [#allocation9], 0 }
   0x8   :  { %19 = vsyncpa [#allocation12], 0 }
   0x9   :  { %20 = vsyncpa [#allocation4], 0 }
   0xa   :  { %22 = vsyncpa [#allocation4 + $0x1], 0  ;;  %s3179_s30 = smov 0   ;;  %s3181_s10 = smov 0  }
   0xb   :  { %s3183_s11 = smov 0   ;;  %s3185_s12 = smov 0  }
   0xc LB: > { %s3389_s1 = sld [smem:[#allocation19_spill]]  ;;  %s3203_s16 = sadd.s32 4294967295, %s3118_s12   ;;  %s3118_s12 = sphi %s3185_s12, %s3402_s12   ;;  %s3114_s11 = sphi %s3183_s11, %s3401_s11   ;;  %s3110_s10 = sphi %s3181_s10, %s3400_s10   ;;  %s3106_s30 = sphi %s3179_s30, %s3399_s30  }
   0xd   : > { %p1971_p0 = scmp.ge.s32.totalorder %s3118_s12, 1  ;;  %p49_p1 = scmp.eq.s32.totalorder %s3203_s16, 0 }
   0xe   : > { %p253_p2 = scmp.lt.s32.totalorder %s3118_s12, 3  ;;  %s3120_s18 = smov [#allocation5]  }
   0xf   : > { %s266_s19 = sshll.u32 %s3120_s18, 4  ;;  %s3391_s4 = sld [smem:[#allocation21_spill]]  ;;  %s267_s19 = int_to_ptr.vmem [resolvable:$true] %s266_s19 }
  0x10   : > { %p3208_p3 = pnand %p1971_p0, %p253_p2  ;;  %s3393_s3 = sld [smem:[#allocation20_spill]] }
  0x11   : > { %s3121_s27 = smov [#allocation8]   ;;  %s3122_s29 = smov 64  }
  0x12   : > { %s264_s15 = sshll.u32 %s3389_s1, 4  ;;  %p2779_p4 = pneg %p3208_p3  ;;  %s265_s15 = int_to_ptr.hbm [resolvable:$true] %s264_s15 }
  0x13   : > { %s297_s28 = sshll.u32 %s3121_s27, 4  ;;  %s3123_s13 = smov 4   ;;  %s298_s28 = int_to_ptr.vmem [resolvable:$true] %s297_s28 }
  0x14   : > { %p3220_p6 = pnand %p2779_p4, %p49_p1  ;;  %s3124_s14 = smov [#allocation7]  }
  0x15   : > { %s295_s22 = sshll.u32 %s3391_s4, 4  ;;  %s283_s18 = sshll.u32 %s3124_s14, 4  ;;  %s296_s22 = int_to_ptr.hbm [resolvable:$true] %s295_s22  ;;  %s284_s18 = int_to_ptr.vmem [resolvable:$true] %s283_s18 }
  0x16   : > { %s281_s26 = sshll.u32 %s3393_s3, 4  ;;  %s309_s24 = sshll.u32 %s3381_s5, 4  ;;  %s282_s26 = int_to_ptr.hbm [resolvable:$true] %s281_s26  ;;  %s310_s24 = int_to_ptr.hbm [resolvable:$true] %s309_s24 }
  0x17   : > { %2782 = dma.hbm_to_vmem [thread:$0]  (!%p3220_p6), %s265_s15, 2048, %s267_s19, [#allocation6], %s3122_s29, %s3122_s29, %s3123_s13  }
  0x18   : > { %2788 = dma.hbm_to_vmem [thread:$0]  (!%p3220_p6), %s296_s22, 128, %s298_s28, [#allocation9], %s3122_s29, %s3122_s29, %s3123_s13  }
  0x19   : > { %s3125_s25 = smov 256   ;;  %s3126_s27 = smov 16  }
  0x1a   : > { %2785 = dma.hbm_to_vmem [thread:$0]  (!%p3220_p6), %s282_s26, 8192, %s284_s18, [#allocation6], %s3125_s25, %s3125_s25, %s3126_s27  }
  0x1b   : > { %s3127_s15 = smov [#allocation10]   ;;  %s326_s14 = sshll.u32 %s3383_s7, 4  ;;  %s327_s14 = int_to_ptr.hbm [resolvable:$true] %s326_s14 }
  0x1c   : > { %s311_s19 = sshll.u32 %s3127_s15, 4  ;;  %s3128_s26 = smov [#allocation11]   ;;  %s312_s19 = int_to_ptr.vmem [resolvable:$true] %s311_s19 }
  0x1d   : > { %2791 = dma.hbm_to_vmem [thread:$0]  (!%p3220_p6), %s310_s24, 8192, %s312_s19, [#allocation9], %s3122_s29, %s3122_s29, %s3123_s13  }
  0x1e   : > { %s328_s18 = sshll.u32 %s3128_s26, 4  ;;  %s1970_s20 = sadd.s32 4294967294, %s3118_s12   ;;  %s329_s18 = int_to_ptr.vmem [resolvable:$true] %s328_s18 }
  0x1f   : > { %2794 = dma.hbm_to_vmem [thread:$0]  (!%p3220_p6), %s327_s14, 1024, %s329_s18, [#allocation12], %s3122_s29, %s3122_s29, %s3123_s13  }
  0x20   : > { %s3245_s21 = sadd.s32 1, %s3118_s12   ;;  %s35_s25 = sadd.s32 1, %s3114_s11 }
  0x21   : > { %s32_s27 = ssub.s32 %s3118_s12, %s3245_s21  ;;  %p42_p7 = scmp.ne.s32.totalorder %s3114_s11, %s3110_s10 }
  0x22   : > { %p33_p8 = scmp.eq.s32.totalorder %s32_s27, 0  ;;  %p43_p9 = scmp.eq.s32.totalorder %s3118_s12, 0 }
  0x23   : > { %p48_p10 = scmp.ne.s32.totalorder %s3110_s10, %s3106_s30  ;;  %p240_p11 = scmp.eq.s32.totalorder %s3203_s16, 1 }
  0x24   : > { %s3257_s24 = scalar_select %p33_p8, %s3114_s11, %s35_s25  }
  0x25   : > { %p3261_p12 = por %p49_p1, %p48_p10  ;;  %p3265_p13 = por %p240_p11, %p42_p7 }
  0x26   : > { %p246_p0 = scmp.eq.s32.totalorder %s1970_s20, 1  ;;  %p44_p2 = por %p43_p9, %p42_p7 }
  0x27   : > { %s345_s13 = sand.u32 1, %s3114_s11   ;;  %p2808_p6 = scmp.lt.s32.totalorder %s3118_s12, 2 }
  0x28   : > { %p3270_p4 = por %p246_p0, %p48_p10  ;;  %s1978_s19 = sshll.u32 %s345_s13, 4 }
  0x29   : > { %s2602_s22 = sshll.u32 %s3118_s12, 4  ;;  %s349_s25 = scalar_lea.vmem [#allocation2], %s1978_s19 }
  0x2a   : > { %s354_s26 = scalar_lea.hbm %s3376_s0, %s2602_s22  ;;  %s358_s27 = sshll.u32 %s349_s25, 4  ;;  %s359_s27 = int_to_ptr.vmem [resolvable:$true] %s358_s27 }
  0x2b   : > { %s356_s18 = sshll.u32 %s354_s26, 4  ;;  %p3279_p8 = pnand %p2808_p6, %p44_p2  ;;  %s357_s18 = int_to_ptr.hbm [resolvable:$true] %s356_s18 }
  0x2c   : > { %s346_s1 = scalar_lea.sflag [#allocation3], %s345_s13  ;;  %s3010_s3 = sshra.s32 %s357_s18, 4  ;;  %s3011_s3 = int_to_ptr.hbm [resolvable:$true] %s3010_s3 }
  0x2d   : > { %s3012_s4 = scalar_lea.hbm %s3011_s3, 16  ;;  %p3014_p9 = pneg %p3279_p8 }
  0x2e   : > { %p3013_p7 = scmp.ne.s32.totalorder %s3011_s3, %s3012_s4  ;;  %s3017_s19 = scalar_lea.hbm %s3376_s0, 32 }
  0x2f   : > { %p3018_p0 = scmp.lt.s32.totalorder %s3011_s3, %s3376_s0  ;;  %p3019_p2 = scmp.lt.s32.totalorder %s3017_s19, %s3012_s4 }
  0x30   : > { %p3015_p10 = pnand %p3014_p9, %p3013_p7 }
  0x31   : > { %p3020_p6 = por %p3019_p2, %p3018_p0 }
  0x32   : > { %p3016_p11 = pneg %p3015_p10 }
  0x34   : > { %p3021_p5 = pnand %p3020_p6, %p3016_p11 }
  0x36   : > { %3024 = shalt.err (!%p3021_p5)
}
  0x37   : > { %2798 = dma.hbm_to_vmem [thread:$0]  (!%p3279_p8), %s357_s18, 256, %s359_s27, %s346_s1  }
  0x38   : > { %367 = sbr.rel (%p3208_p3) target bundleno = 938 (0x3aa), region = 56  ;;  %s3296_s13 = sand.u32 (!%p3208_p3), 1, %s3110_s10  }
  0x39   : > { %s1982_s25 = sshll.u32 (!%p3208_p3), %s3296_s13, 4  ;;  %s370_s22 = scalar_lea.sflag (!%p3208_p3), [#allocation3], %s3296_s13 }
  0x3a   : > { %s3300_s28 = scalar_lea.vmem (!%p3208_p3), [#allocation2], %s1982_s25 }
  0x3d   : > { %3085 = dma.done.wait (%p3261_p12), %s370_s22, 256  }
  0x3e   : > { %3087 = vsyncadd (%p3261_p12), %s370_s22, 4294967040 }
  0x3f   : > { %3089 = dma.done.wait (%p49_p1), [#allocation6], 10240  }
  0x40   : > { %3091 = vsyncadd (%p49_p1), [#allocation6], 4294957056 }
  0x41   : > { %3093 = dma.done.wait (%p49_p1), [#allocation9], 8320  }
  0x42   : > { %3095 = vsyncadd (%p49_p1), [#allocation9], 4294958976 }
  0x43   : > { %3097 = dma.done.wait (%p49_p1), [#allocation12], 1024  }
  0x44   : > { %3099 = vsyncadd (%p49_p1), [#allocation12], 4294966272  ;;  %v2610_v0 = vld [vmem:[#allocation5 + $0x38] sm:$0xff]  ;;  %v2609_v2 = vld [vmem:[#allocation5 + $0x30] sm:$0xff]  ;;  %s2599_s27 = sshll.u32 %s3203_s16, 3  ;;  %s1988_s20 = sshll.u32 %s3296_s13, 3 }
  0x45   : > { %v2618_v1 = vld [vmem:[#allocation5 + $0x78] sm:$0xff]  ;;  %570 = vmatpush.bf16.msra.mxu0 %v2610_v0  ;;  %v2617_v3 = vld [vmem:[#allocation5 + $0x70] sm:$0xff]  ;;  %v2608_v4 = vld [vmem:[#allocation5 + $0x28] sm:$0xff]  ;;  %s1847_s26 = scalar_lea.hbm %s3385_s9, %s2599_s27  ;;  %s1837_s4 = scalar_lea.sflag [#allocation4], %s3296_s13 }
  0x46   : > { %583 = vmatpush.bf16.msra.mxu1 %v2618_v1  ;;  %v2616_v5 = vld [vmem:[#allocation5 + $0x68] sm:$0xff]  ;;  %v2167_v6 = vld [vmem:[#allocation7 + $0xe0] sm:$0xf]  ;;  %v2649_v7 = vld [vmem:[#allocation7 + $0xec] sm:$0xf0]  ;;  %s1851_s3 = sshll.u32 %s1847_s26, 4  ;;  %s1852_s3 = int_to_ptr.hbm [resolvable:$true] %s1851_s3 }
  0x47   : > { %v2647_v8 = vld [vmem:[#allocation7 + $0xe4] sm:$0xf]  ;;  %v2168_v9 = vor.u32 %v2649_v7, %v2167_v6  ;;  %v2169_v10 = vld [vmem:[#allocation7 + $0xf0] sm:$0xf0]  ;;  %v2151_v12 = vld [vmem:[#allocation7 + $0xc0] sm:$0xf] }
  0x48   : > { %v2172_v11 = vor.u32 %v2647_v8, %v2169_v10  ;;  %v2645_v13 = vld [vmem:[#allocation7 + $0xcc] sm:$0xf0]  ;;  %v2643_v14 = vld [vmem:[#allocation7 + $0xc4] sm:$0xf]  ;;  %v2153_v15 = vld [vmem:[#allocation7 + $0xd0] sm:$0xf0] }
  0x49   : > { %571 = vmatpush.bf16.msra.mxu0 %v2609_v2  ;;  %799 = vmatpush.bf16.msra.mxu2 %v2168_v9  ;;  %v2607_v16 = vld [vmem:[#allocation5 + $0x20] sm:$0xff]  ;;  %v2152_v18 = vor.u32 %v2645_v13, %v2151_v12  ;;  %v2156_v19 = vor.u32 %v2643_v14, %v2153_v15  ;;  %v2641_v21 = vld [vmem:[#allocation7 + $0xac] sm:$0xf0]  ;;  %v2137_v23 = vld [vmem:[#allocation7 + $0xb0] sm:$0xf0]  ;;  %s3054_s16 = sshra.s32 %s1852_s3, 4  ;;  %s3055_s16 = int_to_ptr.hbm [resolvable:$true] %s3054_s16 }
  0x4a   : > { %584 = vmatpush.bf16.msra.mxu1 %v2617_v3  ;;  %v2615_v17 = vld [vmem:[#allocation5 + $0x60] sm:$0xff]  ;;  %812 = vmatpush.bf16.msra.mxu3 %v2172_v11  ;;  %v2606_v24 = vld [vmem:[#allocation5 + $0x18] sm:$0xff]  ;;  %v2637_v28 = vld [vmem:[#allocation7 + $0x8c] sm:$0xf0]  ;;  %s3056_s17 = scalar_lea.hbm %s3055_s16, 8  ;;  %s3060_s27 = scalar_lea.hbm %s3385_s9, 16 }
  0x4b   : > { %v2135_v20 = vld [vmem:[#allocation7 + $0xa0] sm:$0xf]  ;;  %v2639_v22 = vld [vmem:[#allocation7 + $0xa4] sm:$0xf]  ;;  %v2614_v26 = vld [vmem:[#allocation5 + $0x58] sm:$0xff]  ;;  %p3057_p1 = scmp.ne.s32.totalorder %s3055_s16, %s3056_s17  ;;  %p3061_p12 = scmp.lt.s32.totalorder %s3055_s16, %s3385_s9 }
  0x4c   : > { %v2136_v25 = vor.u32 %v2641_v21, %v2135_v20  ;;  %v2119_v27 = vld [vmem:[#allocation7 + $0x80] sm:$0xf]  ;;  %v2140_v29 = vor.u32 %v2639_v22, %v2137_v23  ;;  %v2635_v30 = vld [vmem:[#allocation7 + $0x84] sm:$0xf]  ;;  %v2121_v31 = vld [vmem:[#allocation7 + $0x90] sm:$0xf0]  ;;  %p3062_p8 = scmp.lt.s32.totalorder %s3060_s27, %s3056_s17 }
  0x4d   : > { %572 = vmatpush.bf16.msra.mxu0 %v2608_v4  ;;  %800 = vmatpush.bf16.msra.mxu2 %v2152_v18  ;;  %v2605_v32 = vld [vmem:[#allocation5 + $0x10] sm:$0xff]  ;;  %v2120_v33 = vor.u32 %v2637_v28, %v2119_v27  ;;  %v2103_v35 = vld [vmem:[#allocation7 + $0x60] sm:$0xf]  ;;  %v2124_v37 = vor.u32 %v2635_v30, %v2121_v31  ;;  %v2631_v38 = vld [vmem:[#allocation7 + $0x64] sm:$0xf]  ;;  %p3058_p3 = pnand %p3057_p1, %p3265_p13 }
  0x4e   : > { %585 = vmatpush.bf16.msra.mxu1 %v2616_v5  ;;  %813 = vmatpush.bf16.msra.mxu3 %v2156_v19  ;;  %v2613_v34 = vld [vmem:[#allocation5 + $0x50] sm:$0xff]  ;;  %v2604_v40 = vld [vmem:[#allocation5 + $0x8] sm:$0xff]  ;;  %v2087_v43 = vld [vmem:[#allocation7 + $0x40] sm:$0xf]  ;;  %p3063_p7 = por %p3062_p8, %p3061_p12 }
  0x4f   : > { %v2633_v36 = vld [vmem:[#allocation7 + $0x6c] sm:$0xf0]  ;;  %v2105_v39 = vld [vmem:[#allocation7 + $0x70] sm:$0xf0]  ;;  %v2612_v41 = vld [vmem:[#allocation5 + $0x48] sm:$0xff]  ;;  %p3059_p5 = pneg %p3058_p3 }
  0x50   : > { %v2104_v42 = vor.u32 %v2633_v36, %v2103_v35  ;;  %v2629_v44 = vld [vmem:[#allocation7 + $0x4c] sm:$0xf0]  ;;  %v2175_v45 = vld [vmem:[#allocation7 + $0xe8] sm:$0xf]  ;;  %v2108_v46 = vor.u32 %v2631_v38, %v2105_v39  ;;  %v2650_v47 = vld [vmem:[#allocation7 + $0xf4] sm:$0xf0] }
  0x51   : > { %573 = vmatpush.bf16.msra.mxu0 %v2607_v16  ;;  %801 = vmatpush.bf16.msra.mxu2 %v2136_v25  ;;  %v2648_v48 = vld [vmem:[#allocation7 + $0xec] sm:$0xf]  ;;  %v2177_v49 = vld [vmem:[#allocation7 + $0xf8] sm:$0xf0]  ;;  %v2603_v50 = vld [vmem:[#allocation5] sm:$0xff]  ;;  %v2088_v51 = vor.u32 %v2629_v44, %v2087_v43  ;;  %v2176_v57 = vor.u32 %v2650_v47, %v2175_v45  ;;  %p3064_p9 = pnand %p3063_p7, %p3059_p5 }
  0x52   : > { %586 = vmatpush.bf16.msra.mxu1 %v2615_v17  ;;  %814 = vmatpush.bf16.msra.mxu3 %v2140_v29  ;;  %v2627_v52 = vld [vmem:[#allocation7 + $0x44] sm:$0xf]  ;;  %v2089_v53 = vld [vmem:[#allocation7 + $0x50] sm:$0xf0]  ;;  %v435_v56 = vld [vmem:[%s3300_s28 + $0x8] sm:$0xff]  ;;  %v2180_v58 = vor.u32 %v2648_v48, %v2177_v49 }
  0x53   : > { %v2611_v54 = vld [vmem:[#allocation5 + $0x40] sm:$0xff]  ;;  %v2159_v59 = vld [vmem:[#allocation7 + $0xc8] sm:$0xf]  ;;  %v2646_v60 = vld [vmem:[#allocation7 + $0xd4] sm:$0xf0]  ;;  %v2092_v63 = vor.u32 %v2627_v52, %v2089_v53  ;;  %v437_v1 = vpack.c.bf16 %v435_v56, %v435_v56 }
  0x54   : > { %v434_v55 = vld [vmem:[%s3300_s28] sm:$0xff]  ;;  %v2644_v61 = vld [vmem:[#allocation7 + $0xcc] sm:$0xf]  ;;  %v2161_v62 = vld [vmem:[#allocation7 + $0xd8] sm:$0xf0]  ;;  %v2160_v2 = vor.u32 %v2646_v60, %v2159_v59  ;;  %s433_s28 = scalar_lea.vmem [#allocation13], %s1988_s20 }
  0x55   : > { %574 = vmatpush.bf16.msra.mxu0 %v2606_v24  ;;  %802 = vmatpush.bf16.msra.mxu2 %v2120_v33  ;;  %v436_v0 = vpack.c.bf16 %v434_v55, %v434_v55  ;;  %v2164_v3 = vor.u32 %v2644_v61, %v2161_v62  ;;  %v2143_v4 = vld [vmem:[#allocation7 + $0xa8] sm:$0xf]  ;;  %v2642_v5 = vld [vmem:[#allocation7 + $0xb4] sm:$0xf0]  ;;  %v2640_v6 = vld [vmem:[#allocation7 + $0xac] sm:$0xf] }
  0x56   : > { %587 = vmatpush.bf16.msra.mxu1 %v2614_v26  ;;  %815 = vmatpush.bf16.msra.mxu3 %v2124_v37  ;;  %v2145_v7 = vld [vmem:[#allocation7 + $0xb8] sm:$0xf0]  ;;  %v2144_v8 = vor.u32 %v2642_v5, %v2143_v4  ;;  %v2127_v10 = vld [vmem:[#allocation7 + $0x88] sm:$0xf]  ;;  %v2638_v11 = vld [vmem:[#allocation7 + $0x94] sm:$0xf0] }
  0x57   : > { %v2148_v9 = vor.u32 %v2640_v6, %v2145_v7  ;;  %v2636_v12 = vld [vmem:[#allocation7 + $0x8c] sm:$0xf]  ;;  %v2129_v13 = vld [vmem:[#allocation7 + $0x98] sm:$0xf0]  ;;  %v2128_v14 = vor.u32 %v2638_v11, %v2127_v10  ;;  %v2111_v16 = vld [vmem:[#allocation7 + $0x68] sm:$0xf] }
  0x58   : > { %v2132_v15 = vor.u32 %v2636_v12, %v2129_v13  ;;  %v2634_v17 = vld [vmem:[#allocation7 + $0x74] sm:$0xf0]  ;;  %v2632_v18 = vld [vmem:[#allocation7 + $0x6c] sm:$0xf]  ;;  %v2113_v19 = vld [vmem:[#allocation7 + $0x78] sm:$0xf0] }
  0x59   : > { %575 = vmatpush.bf16.msra.mxu0 %v2605_v32  ;;  %803 = vmatpush.bf16.msra.mxu2 %v2104_v42  ;;  %v2112_v20 = vor.u32 %v2634_v17, %v2111_v16  ;;  %v2116_v21 = vor.u32 %v2632_v18, %v2113_v19  ;;  %v2095_v22 = vld [vmem:[#allocation7 + $0x48] sm:$0xf]  ;;  %v2630_v23 = vld [vmem:[#allocation7 + $0x54] sm:$0xf0]  ;;  %v2628_v24 = vld [vmem:[#allocation7 + $0x4c] sm:$0xf] }
  0x5a   : > { %588 = vmatpush.bf16.msra.mxu1 %v2613_v34  ;;  %816 = vmatpush.bf16.msra.mxu3 %v2108_v46  ;;  %v2097_v25 = vld [vmem:[#allocation7 + $0x58] sm:$0xf0]  ;;  %v2096_v26 = vor.u32 %v2630_v23, %v2095_v22  ;;  %v2071_v28 = vld [vmem:[#allocation7 + $0x20] sm:$0xf]  ;;  %v2625_v29 = vld [vmem:[#allocation7 + $0x2c] sm:$0xf0] }
  0x5b   : > { %v2100_v27 = vor.u32 %v2628_v24, %v2097_v25  ;;  %v2623_v30 = vld [vmem:[#allocation7 + $0x24] sm:$0xf]  ;;  %v2072_v31 = vor.u32 %v2625_v29, %v2071_v28  ;;  %v2073_v32 = vld [vmem:[#allocation7 + $0x30] sm:$0xf0]  ;;  %v2079_v33 = vld [vmem:[#allocation7 + $0x28] sm:$0xf] }
  0x5c   : > { %v2626_v34 = vld [vmem:[#allocation7 + $0x34] sm:$0xf0]  ;;  %v2076_v35 = vor.u32 %v2623_v30, %v2073_v32  ;;  %v2624_v37 = vld [vmem:[#allocation7 + $0x2c] sm:$0xf]  ;;  %v2081_v38 = vld [vmem:[#allocation7 + $0x38] sm:$0xf0] }
  0x5d   : > { %576 = vmatpush.bf16.msra.mxu0 %v2604_v40  ;;  %804 = vmatpush.bf16.msra.mxu2 %v2088_v51  ;;  %v2080_v36 = vor.u32 %v2626_v34, %v2079_v33  ;;  %v2084_v39 = vor.u32 %v2624_v37, %v2081_v38  ;;  %v2055_v40 = vld [vmem:[#allocation7] sm:$0xf]  ;;  %v2619_v42 = vld [vmem:[#allocation7 + $0x4] sm:$0xf]  ;;  %v2057_v44 = vld [vmem:[#allocation7 + $0x10] sm:$0xf0] }
  0x5e   : > { %589 = vmatpush.bf16.msra.mxu1 %v2612_v41  ;;  %817 = vmatpush.bf16.msra.mxu3 %v2092_v63  ;;  %v2621_v41 = vld [vmem:[#allocation7 + $0xc] sm:$0xf0]  ;;  %v2063_v45 = vld [vmem:[#allocation7 + $0x8] sm:$0xf]  ;;  %v2622_v46 = vld [vmem:[#allocation7 + $0x14] sm:$0xf0]  ;;  %v2060_v47 = vor.u32 %v2619_v42, %v2057_v44 }
  0x5f   : > { %v2056_v43 = vor.u32 %v2621_v41, %v2055_v40  ;;  %v2064_v48 = vor.u32 %v2622_v46, %v2063_v45  ;;  %v2620_v49 = vld [vmem:[#allocation7 + $0xc] sm:$0xf]  ;;  %v2674_v52 = vld [vmem:[#allocation10 + $0xb8] sm:$0xff]  ;;  %v2673_v56 = vld [vmem:[#allocation10 + $0xb0] sm:$0xff]  ;;  %s1849_s1 = sshll.u32 %s433_s28, 4  ;;  %s1850_s1 = int_to_ptr.vmem [resolvable:$true] %s1849_s1 }
  0x60   : > { %v2682_v53 = vld [vmem:[#allocation10 + $0xf8] sm:$0xff]  ;;  %v2665_v59 = vld [vmem:[#allocation10 + $0x70] sm:$0xff]  ;;  %v2672_v60 = vld [vmem:[#allocation10 + $0xa8] sm:$0xff] }
  0x61   : > { %577 = vmatpush.bf16.msra.mxu0 %v2603_v50  ;;  %805 = vmatpush.bf16.msra.mxu2 %v2072_v31  ;;  %v2065_v50 = vld [vmem:[#allocation7 + $0x18] sm:$0xf0]  ;;  %v2666_v55 = vld [vmem:[#allocation10 + $0x78] sm:$0xff]  ;;  %v2680_v61 = vld [vmem:[#allocation10 + $0xe8] sm:$0xff] }
  0x62   : > { %590 = vmatpush.bf16.msra.mxu1 %v2611_v54  ;;  %818 = vmatpush.bf16.msra.mxu3 %v2076_v35  ;;  %v2068_v51 = vor.u32 %v2620_v49, %v2065_v50  ;;  %v2658_v54 = vld [vmem:[#allocation10 + $0x38] sm:$0xff]  ;;  %v2656_v62 = vld [vmem:[#allocation10 + $0x28] sm:$0xff]  ;;  %v2667_v22 = vld [vmem:[#allocation10 + $0x80] sm:$0xff] }
  0x63   : > { %v2664_v63 = vld [vmem:[#allocation10 + $0x68] sm:$0xff]  ;;  %v2670_v4 = vld [vmem:[#allocation10 + $0x98] sm:$0xff]  ;;  %v2675_v23 = vld [vmem:[#allocation10 + $0xc0] sm:$0xff] }
  0x64   : > { %578 = vmatmul.bf16.vlgmr.msra.gmra.mxu0 %v436_v0  ;;  %v2671_v0 = vld [vmem:[#allocation10 + $0xa0] sm:$0xff]  ;;  %v2678_v5 = vld [vmem:[#allocation10 + $0xd8] sm:$0xff]  ;;  %v2668_v18 = vld [vmem:[#allocation10 + $0x88] sm:$0xff] }
  0x65   : > { %825 = vmatpush.bf16.msrb.mxu0 %v2176_v57  ;;  %591 = vmatmul.bf16.vlgmr.msra.gmra.mxu1 %v437_v1  ;;  %v2681_v57 = vld [vmem:[#allocation10 + $0xf0] sm:$0xff]  ;;  %v2679_v1 = vld [vmem:[#allocation10 + $0xe0] sm:$0xff]  ;;  %v2654_v6 = vld [vmem:[#allocation10 + $0x18] sm:$0xff] }
  0x66   : > { %838 = vmatpush.bf16.msrb.mxu1 %v2180_v58  ;;  %806 = vmatpush.bf16.msra.mxu2 %v2056_v43  ;;  %v2657_v58 = vld [vmem:[#allocation10 + $0x30] sm:$0xff]  ;;  %v2662_v7 = vld [vmem:[#allocation10 + $0x58] sm:$0xff]  ;;  %v2676_v19 = vld [vmem:[#allocation10 + $0xc8] sm:$0xff] }
  0x67   : > { %819 = vmatpush.bf16.msra.mxu3 %v2060_v47  ;;  %v2856_v10 = vld [vmem:[%s3378_s2] ss:$0 sm:$0xff]  ;;  %v2652_v24 = vld [vmem:[#allocation10 + $0x8] sm:$0xff]  ;;  %v2711_v30 = vld [vmem:[#allocation7 + $0x1e4] sm:$0xf] }
  0x68   : > { %v2660_v25 = vld [vmem:[#allocation10 + $0x48] sm:$0xff]  ;;  %v2423_v28 = vld [vmem:[#allocation7 + $0x1e0] sm:$0xf]  ;;  %v2431_v33 = vld [vmem:[#allocation7 + $0x1e8] sm:$0xf] }
  0x69   : > { %826 = vmatpush.bf16.msrb.mxu0 %v2160_v2  ;;  %v2655_v2 = vld [vmem:[#allocation10 + $0x20] sm:$0xff]  ;;  %v2713_v29 = vld [vmem:[#allocation7 + $0x1ec] sm:$0xf0]  ;;  %v2425_v32 = vld [vmem:[#allocation7 + $0x1f0] sm:$0xf0] }
  0x6a   : > { %839 = vmatpush.bf16.msrb.mxu1 %v2164_v3  ;;  %1119 = vmatpush.bf16.msrb.mxu2 %v2658_v54  ;;  %v2663_v3 = vld [vmem:[#allocation10 + $0x60] sm:$0xff]  ;;  %v2424_v31 = vor.u32 %v2713_v29, %v2423_v28  ;;  %v2714_v34 = vld [vmem:[#allocation7 + $0x1f4] sm:$0xf0]  ;;  %v2428_v35 = vor.u32 %v2711_v30, %v2425_v32  ;;  %v2433_v38 = vld [vmem:[#allocation7 + $0x1f8] sm:$0xf0] }
  0x6b   : > { %1132 = vmatpush.bf16.msrb.mxu3 %v2666_v55  ;;  %v2712_v37 = vld [vmem:[#allocation7 + $0x1ec] sm:$0xf]  ;;  %v2709_v41 = vld [vmem:[#allocation7 + $0x1cc] sm:$0xf0]  ;;  %v2707_v42 = vld [vmem:[#allocation7 + $0x1c4] sm:$0xf] }
  0x6c   : > { %v2436_v40 = vor.u32 %v2712_v37, %v2433_v38  ;;  %v2409_v43 = vld [vmem:[#allocation7 + $0x1d0] sm:$0xf0]  ;;  %v2415_v46 = vld [vmem:[#allocation7 + $0x1c8] sm:$0xf]  ;;  %v2710_v47 = vld [vmem:[#allocation7 + $0x1d4] sm:$0xf0] }
  0x6d   : > { %827 = vmatpush.bf16.msrb.mxu0 %v2144_v8  ;;  %v2669_v8 = vld [vmem:[#allocation10 + $0x90] sm:$0xff]  ;;  %v2412_v45 = vor.u32 %v2707_v42, %v2409_v43  ;;  %v2416_v49 = vor.u32 %v2710_v47, %v2415_v46  ;;  %v2699_v28 = vld [vmem:[#allocation7 + $0x184] sm:$0xf]  ;;  %v2377_v29 = vld [vmem:[#allocation7 + $0x190] sm:$0xf0] }
  0x6e   : > { %840 = vmatpush.bf16.msrb.mxu1 %v2148_v9  ;;  %1120 = vmatpush.bf16.msrb.mxu2 %v2657_v58  ;;  %v2677_v9 = vld [vmem:[#allocation10 + $0xd0] sm:$0xff]  ;;  %v2383_v32 = vld [vmem:[#allocation7 + $0x188] sm:$0xf]  ;;  %v2359_v38 = vld [vmem:[#allocation7 + $0x160] sm:$0xf] }
  0x6f   : > { %1133 = vmatpush.bf16.msrb.mxu3 %v2665_v59  ;;  %v2417_v50 = vld [vmem:[#allocation7 + $0x1d8] sm:$0xf0]  ;;  %v2361_v42 = vld [vmem:[#allocation7 + $0x170] sm:$0xf0]  ;;  %v2367_v43 = vld [vmem:[#allocation7 + $0x168] sm:$0xf] }
  0x70   : > { %v2696_v47 = vld [vmem:[#allocation7 + $0x16c] sm:$0xf] }
  0x71   : > { %828 = vmatpush.bf16.msrb.mxu0 %v2128_v14 }
  0x72   : > { %841 = vmatpush.bf16.msrb.mxu1 %v2132_v15  ;;  %1121 = vmatpush.bf16.msrb.mxu2 %v2656_v62 }
  0x73   : > { %1134 = vmatpush.bf16.msrb.mxu3 %v2664_v63 }
  0x75   : > { %829 = vmatpush.bf16.msrb.mxu0 %v2112_v20  ;;  %v2653_v20 = vld [vmem:[#allocation10 + $0x10] sm:$0xff] }
  0x76   : > { %842 = vmatpush.bf16.msrb.mxu1 %v2116_v21  ;;  %1122 = vmatpush.bf16.msrb.mxu2 %v2655_v2  ;;  %v2661_v21 = vld [vmem:[#allocation10 + $0x50] sm:$0xff] }
  0x77   : > { %1135 = vmatpush.bf16.msrb.mxu3 %v2663_v3 }
  0x79   : > { %830 = vmatpush.bf16.msrb.mxu0 %v2096_v26  ;;  %v2651_v26 = vld [vmem:[#allocation10] sm:$0xff] }
  0x7a   : > { %843 = vmatpush.bf16.msrb.mxu1 %v2100_v27  ;;  %1123 = vmatpush.bf16.msrb.mxu2 %v2654_v6  ;;  %v2659_v27 = vld [vmem:[#allocation10 + $0x40] sm:$0xff] }
  0x7b   : > { %1136 = vmatpush.bf16.msrb.mxu3 %v2662_v7 }
  0x7d   : > { %831 = vmatpush.bf16.msrb.mxu0 %v2080_v36  ;;  %v2432_v36 = vor.u32 %v2714_v34, %v2431_v33  ;;  %v2702_v33 = vld [vmem:[#allocation7 + $0x194] sm:$0xf0]  ;;  %v2700_v34 = vld [vmem:[#allocation7 + $0x18c] sm:$0xf] }
  0x7e   : > { %844 = vmatpush.bf16.msrb.mxu1 %v2084_v39  ;;  %1124 = vmatpush.bf16.msrb.mxu2 %v2653_v20  ;;  %v2407_v39 = vld [vmem:[#allocation7 + $0x1c0] sm:$0xf]  ;;  %v2706_v20 = vld [vmem:[#allocation7 + $0x1b4] sm:$0xf0] }
  0x7f   : > { %1137 = vmatpush.bf16.msrb.mxu3 %v2661_v21  ;;  %v2408_v44 = vor.u32 %v2709_v41, %v2407_v39  ;;  %v2697_v39 = vld [vmem:[#allocation7 + $0x16c] sm:$0xf0] }
  0x80   : > { %v2360_v41 = vor.u32 %v2697_v39, %v2359_v38  ;;  %v2743_v38 = vld [vmem:[#allocation10 + $0x1e0] sm:$0xff] }
  0x81   : > { %832 = vmatpush.bf16.msrb.mxu0 %v2064_v48  ;;  %v2708_v48 = vld [vmem:[#allocation7 + $0x1cc] sm:$0xf] }
  0x82   : > { %845 = vmatpush.bf16.msrb.mxu1 %v2068_v51  ;;  %1125 = vmatpush.bf16.msrb.mxu2 %v2652_v24  ;;  %v2420_v51 = vor.u32 %v2708_v48, %v2417_v50  ;;  %v2401_v24 = vld [vmem:[#allocation7 + $0x1b8] sm:$0xf0]  ;;  %v2343_v50 = vld [vmem:[#allocation7 + $0x140] sm:$0xf]  ;;  %v2719_v39 = vld [vmem:[#allocation10 + $0x120] sm:$0xff] }
  0x83   : > { %1138 = vmatpush.bf16.msrb.mxu3 %v2660_v25  ;;  %v2375_v25 = vld [vmem:[#allocation7 + $0x180] sm:$0xf]  ;;  %v2369_v48 = vld [vmem:[#allocation7 + $0x178] sm:$0xf0] }
  0x85   : > { %1145 = vmatpush.bf16.msra.mxu0 %v2674_v52  ;;  %v629_v52 = vld [vmem:[#allocation8] sm:$0xf] }
  0x86   : > { %1158 = vmatpush.bf16.msra.mxu1 %v2682_v53  ;;  %1126 = vmatpush.bf16.msrb.mxu2 %v2651_v26  ;;  %v633_v53 = vperm.slane %v629_v52, 2  ;;  %v634_v54 = vperm.slane %v629_v52, 3  ;;  %v631_v59 = vperm.slane %v629_v52, 0 }
  0x87   : > { %1139 = vmatpush.bf16.msrb.mxu3 %v2659_v27  ;;  %v2701_v27 = vld [vmem:[#allocation7 + $0x18c] sm:$0xf0] }
  0x88   : > { %v2376_v30 = vor.u32 %v2701_v27, %v2375_v25  ;;  %v2722_v25 = vld [vmem:[#allocation10 + $0x138] sm:$0xff]  ;;  %v2737_v27 = vld [vmem:[#allocation10 + $0x1b0] sm:$0xff] }
  0x89   : > { %1146 = vmatpush.bf16.msra.mxu0 %v2673_v56 }
  0x8a   : > { %1159 = vmatpush.bf16.msra.mxu1 %v2681_v57 }
  0x8d   : > { %1147 = vmatpush.bf16.msra.mxu0 %v2672_v60  ;;  %v632_v60 = vperm.slane %v629_v52, 1  ;;  %v2691_v52 = vld [vmem:[#allocation7 + $0x144] sm:$0xf] }
  0x8e   : > { %1160 = vmatpush.bf16.msra.mxu1 %v2680_v61 }
  0x91   : > { %1148 = vmatpush.bf16.msra.mxu0 %v2671_v0 }
  0x92   : > { %1161 = vmatpush.bf16.msra.mxu1 %v2679_v1 }
  0x95   : > { %1149 = vmatpush.bf16.msra.mxu0 %v2670_v4 }
  0x96   : > { %1162 = vmatpush.bf16.msra.mxu1 %v2678_v5 }
  0x99   : > { %1150 = vmatpush.bf16.msra.mxu0 %v2669_v8 }
  0x9a   : > { %1163 = vmatpush.bf16.msra.mxu1 %v2677_v9 }
  0x9d   : > { %1151 = vmatpush.bf16.msra.mxu0 %v2668_v18  ;;  %v2393_v18 = vld [vmem:[#allocation7 + $0x1b0] sm:$0xf0] }
  0x9e   : > { %1164 = vmatpush.bf16.msra.mxu1 %v2676_v19  ;;  %v2399_v19 = vld [vmem:[#allocation7 + $0x1a8] sm:$0xf] }
  0xa1   : > { %1152 = vmatpush.bf16.msra.mxu0 %v2667_v22  ;;  %v2400_v22 = vor.u32 %v2706_v20, %v2399_v19  ;;  %v2684_v20 = vld [vmem:[#allocation7 + $0x10c] sm:$0xf] }
  0xa2   : > { %1165 = vmatpush.bf16.msra.mxu1 %v2675_v23  ;;  %v2704_v23 = vld [vmem:[#allocation7 + $0x1ac] sm:$0xf] }
  0xa3   : > { %v2404_v26 = vor.u32 %v2704_v23, %v2401_v24  ;;  %v2738_v23 = vld [vmem:[#allocation10 + $0x1b8] sm:$0xff] }
  0xa4   : > { %v2746_v24 = vld [vmem:[#allocation10 + $0x1f8] sm:$0xff] }
  0xe1   : > { %v579_v11 = vpop.f32.mrf.mxu0 }
  0xe2   : > { %v592_v12 = vpop.f32.mrf.mxu1  ;;  %v580_v13 = vadd.f32 %v2856_v10, %v579_v11 }
  0xe4   : > { %v3323_v14 = vadd.f32 %v592_v12, %v580_v13  ;;  %v2391_v13 = vld [vmem:[#allocation7 + $0x1a0] sm:$0xf] }
  0xe6   : > { %v596_v15 = vpack.c.bf16 %v3323_v14, %v3323_v14 }
  0xe8   : > { %807 = vmatmul.bf16.vlgmr.msra.gmra.mxu2 %v596_v15  ;;  %820 = vmatmul.bf16.vlgmr.msra.gmra.mxu3 %v596_v15 }
  0xe9   : > { %833 = vmatmul.bf16.vlgmr.msrb.gmra.mxu0 %v596_v15  ;;  %846 = vmatmul.bf16.vlgmr.msrb.gmra.mxu1 %v596_v15  ;;  %v581_v16 = vpop.f32.mrf.mxu0  ;;  %v2705_v15 = vld [vmem:[#allocation7 + $0x1ac] sm:$0xf0] }
  0xea   : > { %v594_v17 = vpop.f32.mrf.mxu1  ;;  %1377 = vmatpush.bf16.msra.mxu2 %v2424_v31  ;;  %1390 = vmatpush.bf16.msra.mxu3 %v2428_v35  ;;  %v2703_v16 = vld [vmem:[#allocation7 + $0x1a4] sm:$0xf]  ;;  %v2380_v31 = vor.u32 %v2699_v28, %v2377_v29  ;;  %v2384_v35 = vor.u32 %v2702_v33, %v2383_v32  ;;  %v2745_v28 = vld [vmem:[#allocation10 + $0x1f0] sm:$0xff]  ;;  %v2744_v32 = vld [vmem:[#allocation10 + $0x1e8] sm:$0xff] }
  0xeb   : > { %1403 = vmatpush.bf16.msrb.mxu0 %v2432_v36  ;;  %1416 = vmatpush.bf16.msrb.mxu1 %v2436_v40  ;;  %v2392_v17 = vor.u32 %v2705_v15, %v2391_v13  ;;  %v2396_v21 = vor.u32 %v2703_v16, %v2393_v18  ;;  %v2385_v36 = vld [vmem:[#allocation7 + $0x198] sm:$0xf0]  ;;  %v2695_v40 = vld [vmem:[#allocation7 + $0x164] sm:$0xf]  ;;  %v2313_v15 = vld [vmem:[#allocation7 + $0x110] sm:$0xf0] }
  0xec   : > { %v2388_v37 = vor.u32 %v2700_v34, %v2385_v36  ;;  %v2319_v16 = vld [vmem:[#allocation7 + $0x108] sm:$0xf]  ;;  %v2721_v29 = vld [vmem:[#allocation10 + $0x130] sm:$0xff]  ;;  %v2728_v36 = vld [vmem:[#allocation10 + $0x168] sm:$0xff] }
  0xee   : > { %1378 = vmatpush.bf16.msra.mxu2 %v2408_v44  ;;  %1391 = vmatpush.bf16.msra.mxu3 %v2412_v45  ;;  %v2698_v44 = vld [vmem:[#allocation7 + $0x174] sm:$0xf0]  ;;  %v2364_v45 = vor.u32 %v2695_v40, %v2361_v42  ;;  %v2727_v40 = vld [vmem:[#allocation10 + $0x160] sm:$0xff]  ;;  %v2742_v42 = vld [vmem:[#allocation10 + $0x1d8] sm:$0xff] }
  0xef   : > { %1404 = vmatpush.bf16.msrb.mxu0 %v2416_v49  ;;  %1417 = vmatpush.bf16.msrb.mxu1 %v2420_v51  ;;  %v2368_v46 = vor.u32 %v2698_v44, %v2367_v43  ;;  %v2372_v49 = vor.u32 %v2696_v47, %v2369_v48  ;;  %v2693_v51 = vld [vmem:[#allocation7 + $0x14c] sm:$0xf0]  ;;  %v2726_v47 = vld [vmem:[#allocation10 + $0x158] sm:$0xff] }
  0xf2   : > { %1379 = vmatpush.bf16.msra.mxu2 %v2392_v17  ;;  %1392 = vmatpush.bf16.msra.mxu3 %v2396_v21  ;;  %v2686_v17 = vld [vmem:[#allocation7 + $0x114] sm:$0xf0]  ;;  %v2321_v21 = vld [vmem:[#allocation7 + $0x118] sm:$0xf0] }
  0xf3   : > { %1405 = vmatpush.bf16.msrb.mxu0 %v2400_v22  ;;  %1418 = vmatpush.bf16.msrb.mxu1 %v2404_v26  ;;  %v2320_v19 = vor.u32 %v2686_v17, %v2319_v16  ;;  %v2324_v22 = vor.u32 %v2684_v20, %v2321_v21  ;;  %v2730_v26 = vld [vmem:[#allocation10 + $0x178] sm:$0xff] }
  0xf6   : > { %1380 = vmatpush.bf16.msra.mxu2 %v2376_v30  ;;  %1393 = vmatpush.bf16.msra.mxu3 %v2380_v31  ;;  %v2729_v30 = vld [vmem:[#allocation10 + $0x170] sm:$0xff]  ;;  %v2736_v31 = vld [vmem:[#allocation10 + $0x1a8] sm:$0xff] }
  0xf7   : > { %1406 = vmatpush.bf16.msrb.mxu0 %v2384_v35  ;;  %1419 = vmatpush.bf16.msrb.mxu1 %v2388_v37  ;;  %v2720_v35 = vld [vmem:[#allocation10 + $0x128] sm:$0xff]  ;;  %v2735_v37 = vld [vmem:[#allocation10 + $0x1a0] sm:$0xff] }
  0xfa   : > { %1381 = vmatpush.bf16.msra.mxu2 %v2360_v41  ;;  %1394 = vmatpush.bf16.msra.mxu3 %v2364_v45  ;;  %v2734_v41 = vld [vmem:[#allocation10 + $0x198] sm:$0xff] }
  0xfb   : > { %1407 = vmatpush.bf16.msrb.mxu0 %v2368_v46  ;;  %1420 = vmatpush.bf16.msrb.mxu1 %v2372_v49  ;;  %v2857_v45 = vld [vmem:[%s3382_s6] ss:$0 sm:$0xff] }
  0xfc   : > { %v2718_v46 = vld [vmem:[#allocation10 + $0x118] sm:$0xff] }
 0x166   : > { %v834_v55 = vpop.f32.mrf.mxu0  ;;  %v847_v56 = vpop.f32.mrf.mxu1 }
 0x167   : > { %v835_v57 = vadd.f32 %v834_v55, %v633_v53  ;;  %v848_v58 = vadd.f32 %v847_v56, %v634_v54  ;;  %v2344_v53 = vor.u32 %v2693_v51, %v2343_v50  ;;  %v2345_v54 = vld [vmem:[#allocation7 + $0x150] sm:$0xf0]  ;;  %v2351_v55 = vld [vmem:[#allocation7 + $0x148] sm:$0xf]  ;;  %v2694_v56 = vld [vmem:[#allocation7 + $0x154] sm:$0xf0] }
 0x168   : > { %v2733_v50 = vld [vmem:[#allocation10 + $0x190] sm:$0xff] }
 0x169   : > { %v853_v61 = vmax.f32 %v835_v57, 0.0  ;;  %v854_v62 = vmax.f32 %v848_v58, 0.0  ;;  %v2348_v57 = vor.u32 %v2691_v52, %v2345_v54  ;;  %v2352_v58 = vor.u32 %v2694_v56, %v2351_v55  ;;  %1382 = vmatpush.bf16.msra.mxu2 %v2344_v53  ;;  %v2741_v51 = vld [vmem:[#allocation10 + $0x1d0] sm:$0xff] }
 0x16b   : > { %v857_v63 = vpack.c.bf16 %v853_v61, %v853_v61  ;;  %v858_v0 = vpack.c.bf16 %v854_v62, %v854_v62  ;;  %v808_v1 = vpop.f32.mrf.mxu2  ;;  %v821_v2 = vpop.f32.mrf.mxu3  ;;  %1395 = vmatpush.bf16.msra.mxu3 %v2348_v57  ;;  %1408 = vmatpush.bf16.msrb.mxu0 %v2352_v58  ;;  %v2327_v62 = vld [vmem:[#allocation7 + $0x120] sm:$0xf] }
 0x16c   : > { %v809_v3 = vadd.f32 %v808_v1, %v631_v59  ;;  %v822_v4 = vadd.f32 %v821_v2, %v632_v60  ;;  %v2692_v59 = vld [vmem:[#allocation7 + $0x14c] sm:$0xf]  ;;  %v2353_v60 = vld [vmem:[#allocation7 + $0x158] sm:$0xf0]  ;;  %v2329_v2 = vld [vmem:[#allocation7 + $0x130] sm:$0xf0] }
 0x16d   : > { %1153 = vmatmul.bf16.vlgmr.msra.gmra.mxu0 %v857_v63  ;;  %1166 = vmatmul.bf16.vlgmr.msra.gmra.mxu1 %v858_v0  ;;  %v2356_v61 = vor.u32 %v2692_v59, %v2353_v60  ;;  %v2689_v63 = vld [vmem:[#allocation7 + $0x12c] sm:$0xf0]  ;;  %v2687_v0 = vld [vmem:[#allocation7 + $0x124] sm:$0xf] }
 0x16e   : > { %v851_v5 = vmax.f32 %v809_v3, 0.0  ;;  %v852_v6 = vmax.f32 %v822_v4, 0.0  ;;  %v836_v7 = vpop.f32.mrf.mxu0  ;;  %v849_v8 = vpop.f32.mrf.mxu1  ;;  %v2328_v1 = vor.u32 %v2689_v63, %v2327_v62  ;;  %v2335_v3 = vld [vmem:[#allocation7 + $0x128] sm:$0xf]  ;;  %v2690_v4 = vld [vmem:[#allocation7 + $0x134] sm:$0xf0] }
 0x16f   : > { %1421 = vmatpush.bf16.msrb.mxu1 %v2356_v61  ;;  %v2688_v7 = vld [vmem:[#allocation7 + $0x12c] sm:$0xf]  ;;  %v2337_v8 = vld [vmem:[#allocation7 + $0x138] sm:$0xf0]  ;;  %v2732_v60 = vld [vmem:[#allocation10 + $0x188] sm:$0xff] }
 0x170   : > { %v855_v9 = vpack.c.bf16 %v851_v5, %v851_v5  ;;  %v856_v10 = vpack.c.bf16 %v852_v6, %v852_v6  ;;  %v2332_v5 = vor.u32 %v2687_v0, %v2329_v2  ;;  %v2336_v6 = vor.u32 %v2690_v4, %v2335_v3  ;;  %1383 = vmatpush.bf16.msra.mxu2 %v2328_v1  ;;  %v2740_v61 = vld [vmem:[#allocation10 + $0x1c8] sm:$0xff]  ;;  %v2717_v62 = vld [vmem:[#allocation10 + $0x110] sm:$0xff]  ;;  %v2731_v0 = vld [vmem:[#allocation10 + $0x180] sm:$0xff] }
 0x171   : > { %v2725_v63 = vld [vmem:[#allocation10 + $0x150] sm:$0xff]  ;;  %v2739_v1 = vld [vmem:[#allocation10 + $0x1c0] sm:$0xff]  ;;  %v2724_v2 = vld [vmem:[#allocation10 + $0x148] sm:$0xff] }
 0x172   : > { %1127 = vmatmul.bf16.vlgmr.msrb.gmra.mxu2 %v855_v9  ;;  %1140 = vmatmul.bf16.vlgmr.msrb.gmra.mxu3 %v856_v10  ;;  %v2340_v9 = vor.u32 %v2688_v7, %v2337_v8  ;;  %v2311_v10 = vld [vmem:[#allocation7 + $0x100] sm:$0xf]  ;;  %v2715_v3 = vld [vmem:[#allocation10 + $0x100] sm:$0xff] }
 0x173   : > { %v810_v11 = vpop.f32.mrf.mxu2  ;;  %v823_v12 = vpop.f32.mrf.mxu3  ;;  %1396 = vmatpush.bf16.msra.mxu3 %v2332_v5  ;;  %1409 = vmatpush.bf16.msrb.mxu0 %v2336_v6  ;;  %v2723_v4 = vld [vmem:[#allocation10 + $0x140] sm:$0xff]  ;;  %v2754_v5 = vld [vmem:[#allocation11 + $0x38] sm:$0xff] }
 0x174   : > { %v2685_v11 = vld [vmem:[#allocation7 + $0x10c] sm:$0xf0]  ;;  %v2683_v12 = vld [vmem:[#allocation7 + $0x104] sm:$0xf]  ;;  %1422 = vmatpush.bf16.msrb.mxu1 %v2340_v9 }
 0x175   : > { %v2312_v13 = vor.u32 %v2685_v11, %v2311_v10  ;;  %v2316_v18 = vor.u32 %v2683_v12, %v2313_v15  ;;  %v1207_v6 = vld [vmem:[#allocation8 + $0x4] sm:$0xf] }
 0x176   : > { %v1211_v7 = vperm.slane %v1207_v6, 2  ;;  %v1212_v8 = vperm.slane %v1207_v6, 3  ;;  %v1210_v15 = vperm.slane %v1207_v6, 1 }
 0x177   : > { %1384 = vmatpush.bf16.msra.mxu2 %v2312_v13  ;;  %1397 = vmatpush.bf16.msra.mxu3 %v2316_v18  ;;  %v1209_v13 = vperm.slane %v1207_v6, 0 }
 0x178   : > { %1410 = vmatpush.bf16.msrb.mxu0 %v2320_v19  ;;  %1423 = vmatpush.bf16.msrb.mxu1 %v2324_v22 }
 0x17b   : > { %1699 = vmatpush.bf16.msrb.mxu2 %v2722_v25  ;;  %1712 = vmatpush.bf16.msrb.mxu3 %v2730_v26 }
 0x17c   : > { %1725 = vmatpush.bf16.msra.mxu0 %v2738_v23  ;;  %1738 = vmatpush.bf16.msra.mxu1 %v2746_v24 }
 0x17f   : > { %1700 = vmatpush.bf16.msrb.mxu2 %v2721_v29  ;;  %1713 = vmatpush.bf16.msrb.mxu3 %v2729_v30 }
 0x180   : > { %1726 = vmatpush.bf16.msra.mxu0 %v2737_v27  ;;  %1739 = vmatpush.bf16.msra.mxu1 %v2745_v28 }
 0x183   : > { %1701 = vmatpush.bf16.msrb.mxu2 %v2720_v35  ;;  %1714 = vmatpush.bf16.msrb.mxu3 %v2728_v36  ;;  %v2750_v35 = vld [vmem:[#allocation11 + $0x18] sm:$0xff]  ;;  %v2749_v36 = vld [vmem:[#allocation11 + $0x10] sm:$0xff] }
 0x184   : > { %1727 = vmatpush.bf16.msra.mxu0 %v2736_v31  ;;  %1740 = vmatpush.bf16.msra.mxu1 %v2744_v32  ;;  %v2753_v32 = vld [vmem:[#allocation11 + $0x30] sm:$0xff] }
 0x187   : > { %1702 = vmatpush.bf16.msrb.mxu2 %v2719_v39  ;;  %1715 = vmatpush.bf16.msrb.mxu3 %v2727_v40 }
 0x188   : > { %1728 = vmatpush.bf16.msra.mxu0 %v2735_v37  ;;  %1741 = vmatpush.bf16.msra.mxu1 %v2743_v38  ;;  %v2748_v37 = vld [vmem:[#allocation11 + $0x8] sm:$0xff]  ;;  %v2747_v38 = vld [vmem:[#allocation11] sm:$0xff] }
 0x18b   : > { %1703 = vmatpush.bf16.msrb.mxu2 %v2718_v46  ;;  %1716 = vmatpush.bf16.msrb.mxu3 %v2726_v47 }
 0x18c   : > { %1729 = vmatpush.bf16.msra.mxu0 %v2734_v41  ;;  %1742 = vmatpush.bf16.msra.mxu1 %v2742_v42 }
 0x18f   : > { %1704 = vmatpush.bf16.msrb.mxu2 %v2717_v62  ;;  %1717 = vmatpush.bf16.msrb.mxu3 %v2725_v63 }
 0x190   : > { %1730 = vmatpush.bf16.msra.mxu0 %v2733_v50  ;;  %1743 = vmatpush.bf16.msra.mxu1 %v2741_v51 }
 0x193   : > { %1718 = vmatpush.bf16.msrb.mxu3 %v2724_v2 }
 0x194   : > { %1731 = vmatpush.bf16.msra.mxu0 %v2732_v60  ;;  %1744 = vmatpush.bf16.msra.mxu1 %v2740_v61 }
 0x197   : > { %1719 = vmatpush.bf16.msrb.mxu3 %v2723_v4 }
 0x198   : > { %1732 = vmatpush.bf16.msra.mxu0 %v2731_v0  ;;  %1745 = vmatpush.bf16.msra.mxu1 %v2739_v1 }
 0x1ea   : > { %v1154_v33 = vpop.f32.mrf.mxu0  ;;  %v1167_v34 = vpop.f32.mrf.mxu1 }
 0x1f2   : > { %v1156_v43 = vpop.f32.mrf.mxu0  ;;  %v1169_v44 = vpop.f32.mrf.mxu1 }
 0x1f3   : > { %v2858_v43 = vld [vmem:[%s3382_s6 + $0x1] ss:$0 sm:$0xff] }
 0x1f5   : > { %v1128_v48 = vpop.f32.mrf.mxu2  ;;  %v1141_v49 = vpop.f32.mrf.mxu3 }
 0x1f6   : > { %v1129_v52 = vadd.f32 %v2857_v45, %v1128_v48 }
 0x1f8   : > { %v1142_v53 = vadd.f32 %v1141_v49, %v1129_v52 }
 0x1fa   : > { %v1155_v54 = vadd.f32 %v1154_v33, %v1142_v53  ;;  %v2752_v33 = vld [vmem:[#allocation11 + $0x28] sm:$0xff] }
 0x1fc   : > { %v1168_v55 = vadd.f32 %v1167_v34, %v1155_v54  ;;  %v2751_v34 = vld [vmem:[#allocation11 + $0x20] sm:$0xff] }
 0x1fd   : > { %v1130_v56 = vpop.f32.mrf.mxu2  ;;  %v1143_v57 = vpop.f32.mrf.mxu3 }
 0x1fe   : > { %v3331_v58 = vadd.f32 %v1168_v55, %v3323_v14  ;;  %v2716_v14 = vld [vmem:[#allocation10 + $0x108] sm:$0xff]  ;;  %v2859_v55 = vld [vmem:[%s3384_s8] ss:$0 sm:$0xff] }
 0x1ff   : > { %1705 = vmatpush.bf16.msrb.mxu2 %v2716_v14 }
 0x200   : > { %v1172_v59 = vpack.c.bf16 %v3331_v58, %v3331_v58 }
 0x202   : > { %1385 = vmatmul.bf16.vlgmr.msra.gmra.mxu2 %v1172_v59  ;;  %1398 = vmatmul.bf16.vlgmr.msra.gmra.mxu3 %v1172_v59 }
 0x203   : > { %1411 = vmatmul.bf16.vlgmr.msrb.gmra.mxu0 %v1172_v59  ;;  %1424 = vmatmul.bf16.vlgmr.msrb.gmra.mxu1 %v1172_v59 }
 0x204   : > { %1706 = vmatpush.bf16.msrb.mxu2 %v2715_v3 }
 0x208   : > { %1822 = vmatpush.bf16.msra.mxu2 %v2754_v5 }
 0x20c   : > { %1823 = vmatpush.bf16.msra.mxu2 %v2753_v32 }
 0x210   : > { %1824 = vmatpush.bf16.msra.mxu2 %v2752_v33 }
 0x214   : > { %1825 = vmatpush.bf16.msra.mxu2 %v2751_v34 }
 0x218   : > { %1826 = vmatpush.bf16.msra.mxu2 %v2750_v35 }
 0x21c   : > { %1827 = vmatpush.bf16.msra.mxu2 %v2749_v36 }
 0x220   : > { %1828 = vmatpush.bf16.msra.mxu2 %v2748_v37 }
 0x224   : > { %1829 = vmatpush.bf16.msra.mxu2 %v2747_v38 }
 0x280   : > { %v1412_v9 = vpop.f32.mrf.mxu0  ;;  %v1425_v10 = vpop.f32.mrf.mxu1 }
 0x281   : > { %v1413_v11 = vadd.f32 %v1412_v9, %v1211_v7  ;;  %v1426_v12 = vadd.f32 %v1425_v10, %v1212_v8 }
 0x283   : > { %v1431_v16 = vmax.f32 %v1413_v11, 0.0  ;;  %v1432_v17 = vmax.f32 %v1426_v12, 0.0 }
 0x285   : > { %v1435_v18 = vpack.c.bf16 %v1431_v16, %v1431_v16  ;;  %v1436_v19 = vpack.c.bf16 %v1432_v17, %v1432_v17  ;;  %v1386_v20 = vpop.f32.mrf.mxu2  ;;  %v1399_v21 = vpop.f32.mrf.mxu3 }
 0x286   : > { %v1387_v22 = vadd.f32 %v1386_v20, %v1209_v13  ;;  %v1400_v23 = vadd.f32 %v1399_v21, %v1210_v15 }
 0x287   : > { %1733 = vmatmul.bf16.vlgmr.msra.gmra.mxu0 %v1435_v18  ;;  %1746 = vmatmul.bf16.vlgmr.msra.gmra.mxu1 %v1436_v19 }
 0x288   : > { %v1429_v24 = vmax.f32 %v1387_v22, 0.0  ;;  %v1430_v25 = vmax.f32 %v1400_v23, 0.0  ;;  %v1414_v26 = vpop.f32.mrf.mxu0  ;;  %v1427_v27 = vpop.f32.mrf.mxu1 }
 0x28a   : > { %v1433_v28 = vpack.c.bf16 %v1429_v24, %v1429_v24  ;;  %v1434_v29 = vpack.c.bf16 %v1430_v25, %v1430_v25 }
 0x28c   : > { %1707 = vmatmul.bf16.vlgmr.msrb.gmra.mxu2 %v1433_v28  ;;  %1720 = vmatmul.bf16.vlgmr.msrb.gmra.mxu3 %v1434_v29 }
 0x28d   : > { %v1388_v30 = vpop.f32.mrf.mxu2  ;;  %v1401_v31 = vpop.f32.mrf.mxu3 }
 0x304   : > { %v1734_v39 = vpop.f32.mrf.mxu0  ;;  %v1747_v40 = vpop.f32.mrf.mxu1 }
 0x30c   : > { %v1736_v41 = vpop.f32.mrf.mxu0  ;;  %v1749_v42 = vpop.f32.mrf.mxu1 }
 0x30f   : > { %v1708_v44 = vpop.f32.mrf.mxu2  ;;  %v1721_v45 = vpop.f32.mrf.mxu3 }
 0x310   : > { %v1709_v46 = vadd.f32 %v2858_v43, %v1708_v44 }
 0x312   : > { %v1722_v47 = vadd.f32 %v1721_v45, %v1709_v46 }
 0x314   : > { %v1735_v48 = vadd.f32 %v1734_v39, %v1722_v47 }
 0x316   : > { %v1748_v49 = vadd.f32 %v1747_v40, %v1735_v48 }
 0x317   : > { %v1710_v50 = vpop.f32.mrf.mxu2  ;;  %v1723_v51 = vpop.f32.mrf.mxu3 }
 0x318   : > { %v1751_v52 = vadd.f32 %v1748_v49, %v3331_v58 }
 0x31a   : > { %v1752_v53 = vmax.f32 %v1751_v52, 0.0 }
 0x31c   : > { %v1753_v54 = vpack.c.bf16 %v1752_v53, %v1752_v53 }
 0x31e   : > { %1830 = vmatmul.bf16.vlgmr.msra.gmra.mxu2 %v1753_v54 }
 0x3a1   : > { %v1831_v56 = vpop.f32.mrf.mxu2 }
 0x3a2   : > { %v1832_v57 = vadd.f32 %v2859_v55, %v1831_v56 }
 0x3a4   : > { %1835 = vst [vmem:[%s433_s28] sm:$0xff] %v1832_v57 }
 0x3a5   : > { %3067 = shalt.err (!%p3064_p9)
}
 0x3a6   : > { %2777 = dma.vmem_to_hbm [thread:$0]  (%p3265_p13), %s1850_s1, 128, %s1852_s3, %s1837_s4  }
 0x3a9   : > { %v1833_v58 = vpop.f32.mrf.mxu2 }
 0x3aa PF: > { %s1863_s13 = sand.u32 1, %s3106_s30   ;;  %p3398_p10 = scmp.ge.s32.totalorder %s3118_s12, 2 }
 0x3ab   : > { %s1864_s14 = scalar_lea.sflag [#allocation4], %s1863_s13 }
 0x3ac   : > { %p2800_p11 = pnand %p3398_p10, %p3270_p4 }
 0x3ae   : > { %p2801_p0 = pneg %p2800_p11 }
 0x3b0   : > { %3101 = dma.done.wait (%p2801_p0), %s1864_s14, 128  }
 0x3b1   : > { %3103 = vsyncadd (%p2801_p0), %s1864_s14, 4294967168  ;;  %p25_p2 = scmp.ge.s32.totalorder %s3245_s21, 4   ;;  %s3399_s30 = smov %s3110_s10 }
 0x3b2   : > { %s3400_s10 = smov %s3114_s11  ;;  %s3401_s11 = smov %s3257_s24 }
 0x3b3   : > { %s3402_s12 = smov %s3245_s21  ;;  %27 = sbr.rel (!%p25_p2) target bundleno = 12 (0xc), region = 125 }
 0x3b8   :  { %1870 = vsyncpa [#allocation3], 1 }
 0x3b9   :  { %1872 = vsyncpa [#allocation3 + $0x1], 1 }
 0x3ba   :  { %1873 = vsyncpa [#allocation6], 1 }
 0x3bb   :  { %1874 = vsyncpa [#allocation9], 1 }
 0x3bc   :  { %1875 = vsyncpa [#allocation12], 1 }
 0x3bd   :  { %1876 = vsyncpa [#allocation4], 1 }
 0x3be   :  { %1878 = vsyncpa [#allocation4 + $0x1], 1 }

</bundles_post_ra>
